<compile_context>
chip_gen: v6e
topology: v6e:2x2x1
jax: 0.10.0
libtpu: 0.0.40
codegen_flags: <defaults>
</compile_context>

<pallas_src>
import jax
import jax.numpy as jnp
from jax.experimental import pallas as pl
from jax.experimental.pallas import tpu as pltpu


def _round_up(n, m):
    return ((n + m - 1) // m) * m


# ----------------------------------------------------------------------------
# Static layout of the single packed parameter slab (lane width = 4P).
# ----------------------------------------------------------------------------
def _make_layout(hidden, fea_size, att_size):
    assert hidden[0] == att_size, "encoder input width must equal att_size"
    widths = [fea_size * h for h in hidden]        # un-padded level widths
    S = [_round_up(w, 128) for w in widths]        # lane-padded level widths
    D = widths[-1]                                 # LSTM width (= fea*hidden[-1])
    P = S[-1]                                      # padded per-gate lane width
    G = 4 * P
    n_enc = len(hidden) - 1

    rows = {}
    r = 0
    for l in range(n_enc):                         # block-diag encoder weights
        rows["w%d" % l] = (r, S[l], S[l + 1]); r += S[l]
    rows["wx"] = (r, P, G); r += P                 # fused gate x-projection
    rows["wh"] = (r, P, G); r += P                 # fused gate h-projection
    rows["fcw"] = (r, P, P); r += P                # block-diag fc(10,10)
    for l in range(n_enc):                         # biases: 1 row, 8-row bands
        rows["b%d" % l] = (r, 1, S[l + 1]); r += 8
    rows["bg"] = (r, 1, G); r += 8
    rows["fcb"] = (r, 1, P); r += 8
    return dict(rows=rows, widths=widths, S=S, D=D, P=P, G=G,
                n_enc=n_enc, total_rows=_round_up(r, 8))


# ----------------------------------------------------------------------------
# Fused kernel: encoder MLP -> LSTM recurrence -> fc, all resident in VMEM.
# ----------------------------------------------------------------------------
def _make_fused_kernel(layout, T, B):
    rows = layout["rows"]
    P, G, n_enc = layout["P"], layout["G"], layout["n_enc"]

    def carve(ref, name):                          # static, aligned slice: free
        r, nr, nc = rows[name]
        return ref[r:r + nr, 0:nc]

    def kernel(x_ref, slab_ref, o_ref, gx_vmem):
        f32 = jnp.float32

        # --- Encoder (block-diag per-feature Linears; Dropout = identity) and
        # --- the gate x-projection, batched over ALL T*B rows at once.
        e = x_ref[...]                                           # (T*B, S0)
        for l in range(n_enc):
            e = jnp.maximum(
                jnp.dot(e, carve(slab_ref, "w%d" % l),
                        preferred_element_type=f32)
                + carve(slab_ref, "b%d" % l), 0.0)
        gx = (jnp.dot(e, carve(slab_ref, "wx"), preferred_element_type=f32)
              + carve(slab_ref, "bg"))                           # (T*B, 4P)

        # --- Stage pre-projected gates time-major in VMEM, OFF the recurrence
        # --- critical path (per-step access becomes a plain aligned vld).
        for t in range(T):
            gx_vmem[t] = gx[t * B:(t + 1) * B, :]

        # --- LSTM recurrence, statically unrolled (T is small & fixed).
        wh = carve(slab_ref, "wh")                               # (P, 4P)
        h = jnp.zeros((B, P), f32)
        c = jnp.zeros((B, P), f32)
        for t in range(T):
            gates = gx_vmem[t] + jnp.dot(h, wh,
                                         preferred_element_type=f32)  # (B,4P)
            sig = jax.nn.sigmoid(gates[:, 0:3 * P])   # f,i,o in ONE EUP pass
            f_g = sig[:, 0 * P:1 * P]
            i_g = sig[:, 1 * P:2 * P]
            o_g = sig[:, 2 * P:3 * P]
            g_g = jnp.tanh(gates[:, 3 * P:4 * P])
            c = f_g * c + i_g * g_g
            h = o_g * jnp.tanh(c)
        # Padded lanes (>= D) of h/c stay exactly 0: padded weight cols/biases
        # are 0 => gates_pad = 0 => c_pad = 0.5*c_pad, h_pad = 0.5*tanh(0) = 0.

        # --- fc(ReLU(h)) as block-diag per-feature Linear; written once.
        out = (jnp.dot(jnp.maximum(h, 0.0), carve(slab_ref, "fcw"),
                       preferred_element_type=f32)
               + carve(slab_ref, "fcb"))
        o_ref[...] = out.astype(o_ref.dtype)

    return kernel


# ----------------------------------------------------------------------------
# Wrapper: one pallas_call, 2 input DMAs (x + packed slab), whole-array VMEM.
# ----------------------------------------------------------------------------
def make_embeddings_forward(hidden, step_size, fea_size, att_size):
    layout = _make_layout(hidden, fea_size, att_size)
    W0, S0 = layout["widths"][0], layout["S"][0]
    D, P, G = layout["D"], layout["P"], layout["G"]
    T, h_last = step_size, hidden[-1]

    @jax.jit
    def forward(x, slab):
        B = x.shape[0]
        # (B, T, fea, att) -> time-major (T*B, fea*att), lane-padded to S0.
        # Tiny one-time XLA transpose/pad; keeps the kernel layout-clean.
        x3 = jnp.transpose(x.reshape(B, T, W0), (1, 0, 2)).reshape(T * B, W0)
        if S0 > W0:
            x3 = jnp.pad(x3, ((0, 0), (0, S0 - W0)))

        vmem = pl.BlockSpec(memory_space=pltpu.MemorySpace.VMEM)
        out = pl.pallas_call(
            _make_fused_kernel(layout, T, B),
            out_shape=jax.ShapeDtypeStruct((B, P), jnp.float32),
            in_specs=[vmem, vmem],
            out_specs=vmem,
            scratch_shapes=[pltpu.VMEM((T, B, G), jnp.float32)],
        )(x3, slab)

        # Strip lane padding; (B, D) -> (B, fea, hidden[-1]).
        return out[:, :D].reshape(B, fea_size, h_last)

    return forward


# ----------------------------------------------------------------------------
# Pure-JAX reference (mirrors the PyTorch forward) for a correctness check.
# ----------------------------------------------------------------------------
def embeddings_reference(x, params, *, step_size, fea_size, att_size):
    B = x.shape[0]
    h = x.reshape(-1, fea_size, att_size)
    for (w, b) in params["enc"]:
        h = jnp.maximum(h @ w + b, 0.0)
    h_last = h.shape[-1]
    xs = h.reshape(B, step_size, fea_size * h_last)
    D = xs.shape[-1]
    hs = jnp.zeros((B, D), jnp.float32)
    cs = jnp.zeros((B, D), jnp.float32)
    for t in range(step_size):
        xt = xs[:, t, :]

        def gate(p):
            wx, wh, b = p
            return xt @ wx + hs @ wh + b

        f = jax.nn.sigmoid(gate(params["lstm"]["f"]))
        i = jax.nn.sigmoid(gate(params["lstm"]["i"]))
        o = jax.nn.sigmoid(gate(params["lstm"]["o"]))
        g = jnp.tanh(gate(params["lstm"]["c"]))
        cs = f * cs + i * g
        hs = o * jnp.tanh(cs)
    out = hs.reshape(B, fea_size, h_last)
    return jnp.maximum(out, 0.0) @ params["fc_w"] + params["fc_b"]


# ----------------------------------------------------------------------------
# Deterministic parameter construction (torch-Linear-style uniform init) and
# one-time host-side packing into the single fused, lane-padded slab.
# ----------------------------------------------------------------------------
def _linear_init(key, fan_in, fan_out):
    k = 1.0 / jnp.sqrt(jnp.float32(fan_in))
    kw, kb = jax.random.split(key)
    w = jax.random.uniform(kw, (fan_in, fan_out), jnp.float32, -k, k)
    b = jax.random.uniform(kb, (1, fan_out), jnp.float32, -k, k)
    return w, b


def make_params(key, hidden, fea_size):
    keys = jax.random.split(key, 16)
    ki = iter(keys)
    enc = [_linear_init(next(ki), hidden[i], hidden[i + 1])
           for i in range(len(hidden) - 1)]

    D = fea_size * hidden[-1]     # LSTM input_size == hidden_size == cell_size
    lstm = {}
    for g in ("f", "i", "o", "c"):
        # torch: nn.Linear(input_size + hidden_size, hidden_size) per gate;
        # stored split as Wx (D, D), Wh (D, D), b (1, D) — math-equivalent.
        w_full, b = _linear_init(next(ki), 2 * D, D)
        lstm[g] = (w_full[:D, :], w_full[D:, :], b)

    fc_w, fc_b = _linear_init(next(ki), 10, 10)
    return {"enc": enc, "lstm": lstm, "fc_w": fc_w, "fc_b": fc_b}


def prepare_fused_params(params, hidden, fea_size, att_size):
    """Pack ALL parameters into one lane-padded (rows, 4P) f32 slab matching
    _make_layout, so the kernel does a single parameter DMA."""
    layout = _make_layout(hidden, fea_size, att_size)
    rows, D, P, G = layout["rows"], layout["D"], layout["P"], layout["G"]
    slab = jnp.zeros((layout["total_rows"], G), jnp.float32)

    def put(name, block):
        r, _, _ = rows[name]
        return slab.at[r:r + block.shape[0], :block.shape[1]].set(block)

    eye = jnp.eye(fea_size, dtype=jnp.float32)
    for l, (w, b) in enumerate(params["enc"]):
        slab = put("w%d" % l, jnp.kron(eye, w))            # block-diag Linear
        slab = put("b%d" % l, jnp.tile(b, (1, fea_size)))

    wx = jnp.zeros((P, G), jnp.float32)
    wh = jnp.zeros((P, G), jnp.float32)
    bg = jnp.zeros((1, G), jnp.float32)
    for gi, g in enumerate(("f", "i", "o", "c")):
        wxg, whg, bgg = params["lstm"][g]
        wx = wx.at[:D, gi * P:gi * P + D].set(wxg)
        wh = wh.at[:D, gi * P:gi * P + D].set(whg)
        bg = bg.at[:, gi * P:gi * P + D].set(bgg)
    slab = put("wx", wx)
    slab = put("wh", wh)
    slab = put("bg", bg)

    slab = put("fcw", jnp.kron(eye, params["fc_w"]))       # block-diag fc
    slab = put("fcb", jnp.tile(params["fc_b"], (1, fea_size)))
    return slab


if __name__ == "__main__":
    # Module hyperparameters (hidden[0] == att_size, hidden[-1] == 10 for fc).
    hidden = [16, 32, 10]
    step_size = 8
    fea_size = 4
    att_size = 16
    B = 2
    assert hidden[-1] == 10, "fc is Linear(10, 10)"

    key = jax.random.PRNGKey(0)
    kx, kp = jax.random.split(key)
    x = jax.random.normal(kx, (B, step_size, fea_size, att_size), jnp.float32)
    params = make_params(kp, hidden, fea_size)
    slab = jax.block_until_ready(
        prepare_fused_params(params, hidden, fea_size, att_size))

    forward = make_embeddings_forward(hidden, step_size, fea_size, att_size)
    out = jax.block_until_ready(forward(x, slab))

    ref = embeddings_reference(x, params, step_size=step_size,
                               fea_size=fea_size, att_size=att_size)
    assert out.shape == (B, fea_size, hidden[-1]), out.shape
    assert jnp.allclose(out, ref, rtol=2e-3, atol=2e-3), \
        float(jnp.max(jnp.abs(out - ref)))
    print("KERNEL_OK")
</pallas_src>

<mosaic_0001>
module attributes {stable_mosaic.version = 11 : i64} {
  func.func @kernel(%arg0: memref<16x128xf32, #tpu.memory_space<vmem>>, %arg1: memref<672x512xf32, #tpu.memory_space<vmem>>, %arg2: memref<2x128xf32, #tpu.memory_space<vmem>>, %arg3: memref<8x2x512xf32, #tpu.memory_space<vmem>>) attributes {dimension_semantics = [], scalar_prefetch = 0 : i64, scratch_operands = 1 : i64, tpu.core_type = #tpu.core_type<tc>} {
    %c0 = arith.constant 0 : index
    %c0_0 = arith.constant 0 : index
    %0 = vector.load %arg0[%c0, %c0_0] : memref<16x128xf32, #tpu.memory_space<vmem>>, vector<16x128xf32>
    %c0_1 = arith.constant 0 : index
    %c0_2 = arith.constant 0 : index
    %1 = vector.load %arg1[%c0_1, %c0_2] : memref<672x512xf32, #tpu.memory_space<vmem>>, vector<128x128xf32>
    %cst = arith.constant dense<0.000000e+00> : vector<16x128xf32>
    %2 = tpu.matmul %0, %1, %cst {dimension_numbers = #tpu.dot_dimension_numbers<[1], [0], [0], [1], [0, 0, 1, 1], [], []>} : vector<16x128xf32>, vector<128x128xf32>, vector<16x128xf32> -> vector<16x128xf32>
    %c640 = arith.constant 640 : index
    %c0_3 = arith.constant 0 : index
    %3 = vector.load %arg1[%c640, %c0_3] : memref<672x512xf32, #tpu.memory_space<vmem>>, vector<1x128xf32>
    %4 = vector.broadcast %3 : vector<1x128xf32> to vector<16x128xf32>
    %5 = arith.addf %2, %4 : vector<16x128xf32>
    %cst_4 = arith.constant 0.000000e+00 : f32
    %6 = vector.broadcast %cst_4 : f32 to vector<16x128xf32>
    %7 = arith.maximumf %5, %6 : vector<16x128xf32>
    %c128 = arith.constant 128 : index
    %c0_5 = arith.constant 0 : index
    %8 = vector.load %arg1[%c128, %c0_5] : memref<672x512xf32, #tpu.memory_space<vmem>>, vector<128x128xf32>
    %cst_6 = arith.constant dense<0.000000e+00> : vector<16x128xf32>
    %9 = tpu.matmul %7, %8, %cst_6 {dimension_numbers = #tpu.dot_dimension_numbers<[1], [0], [0], [1], [0, 0, 1, 1], [], []>} : vector<16x128xf32>, vector<128x128xf32>, vector<16x128xf32> -> vector<16x128xf32>
    %c648 = arith.constant 648 : index
    %c0_7 = arith.constant 0 : index
    %10 = vector.load %arg1[%c648, %c0_7] : memref<672x512xf32, #tpu.memory_space<vmem>>, vector<1x128xf32>
    %11 = vector.broadcast %10 : vector<1x128xf32> to vector<16x128xf32>
    %12 = arith.addf %9, %11 : vector<16x128xf32>
    %cst_8 = arith.constant 0.000000e+00 : f32
    %13 = vector.broadcast %cst_8 : f32 to vector<16x128xf32>
    %14 = arith.maximumf %12, %13 : vector<16x128xf32>
    %c256 = arith.constant 256 : index
    %c0_9 = arith.constant 0 : index
    %15 = vector.load %arg1[%c256, %c0_9] : memref<672x512xf32, #tpu.memory_space<vmem>>, vector<128x512xf32>
    %cst_10 = arith.constant dense<0.000000e+00> : vector<16x512xf32>
    %16 = tpu.matmul %14, %15, %cst_10 {dimension_numbers = #tpu.dot_dimension_numbers<[1], [0], [0], [1], [0, 0, 1, 1], [], []>} : vector<16x128xf32>, vector<128x512xf32>, vector<16x512xf32> -> vector<16x512xf32>
    %c656 = arith.constant 656 : index
    %c0_11 = arith.constant 0 : index
    %17 = vector.load %arg1[%c656, %c0_11] : memref<672x512xf32, #tpu.memory_space<vmem>>, vector<1x512xf32>
    %18 = vector.broadcast %17 : vector<1x512xf32> to vector<16x512xf32>
    %19 = arith.addf %16, %18 : vector<16x512xf32>
    %20 = vector.extract_strided_slice %19 {offsets = [0, 0], sizes = [2, 512], strides = [1, 1]} : vector<16x512xf32> to vector<2x512xf32>
    %c0_12 = arith.constant 0 : index
    %c0_13 = arith.constant 0 : index
    %c0_14 = arith.constant 0 : index
    %21 = vector.load %arg3[%c0_12, %c0_13, %c0_14] : memref<8x2x512xf32, #tpu.memory_space<vmem>>, vector<1x2x512xf32>
    %22 = vector.shape_cast %21 : vector<1x2x512xf32> to vector<2x512xf32>
    %23 = vector.shape_cast %20 : vector<2x512xf32> to vector<1x2x512xf32>
    tpu.vector_store %arg3[%c0_12, %c0_13, %c0_14], %23 {strides = array<i32>} : memref<8x2x512xf32, #tpu.memory_space<vmem>>, vector<1x2x512xf32>,
    %24 = vector.extract_strided_slice %19 {offsets = [2, 0], sizes = [2, 512], strides = [1, 1]} : vector<16x512xf32> to vector<2x512xf32>
    %c1 = arith.constant 1 : index
    %c0_15 = arith.constant 0 : index
    %c0_16 = arith.constant 0 : index
    %25 = vector.load %arg3[%c1, %c0_15, %c0_16] : memref<8x2x512xf32, #tpu.memory_space<vmem>>, vector<1x2x512xf32>
    %26 = vector.shape_cast %25 : vector<1x2x512xf32> to vector<2x512xf32>
    %27 = vector.shape_cast %24 : vector<2x512xf32> to vector<1x2x512xf32>
    tpu.vector_store %arg3[%c1, %c0_15, %c0_16], %27 {strides = array<i32>} : memref<8x2x512xf32, #tpu.memory_space<vmem>>, vector<1x2x512xf32>,
    %28 = vector.extract_strided_slice %19 {offsets = [4, 0], sizes = [2, 512], strides = [1, 1]} : vector<16x512xf32> to vector<2x512xf32>
    %c2 = arith.constant 2 : index
    %c0_17 = arith.constant 0 : index
    %c0_18 = arith.constant 0 : index
    %29 = vector.load %arg3[%c2, %c0_17, %c0_18] : memref<8x2x512xf32, #tpu.memory_space<vmem>>, vector<1x2x512xf32>
    %30 = vector.shape_cast %29 : vector<1x2x512xf32> to vector<2x512xf32>
    %31 = vector.shape_cast %28 : vector<2x512xf32> to vector<1x2x512xf32>
    tpu.vector_store %arg3[%c2, %c0_17, %c0_18], %31 {strides = array<i32>} : memref<8x2x512xf32, #tpu.memory_space<vmem>>, vector<1x2x512xf32>,
    %32 = vector.extract_strided_slice %19 {offsets = [6, 0], sizes = [2, 512], strides = [1, 1]} : vector<16x512xf32> to vector<2x512xf32>
    %c3 = arith.constant 3 : index
    %c0_19 = arith.constant 0 : index
    %c0_20 = arith.constant 0 : index
    %33 = vector.load %arg3[%c3, %c0_19, %c0_20] : memref<8x2x512xf32, #tpu.memory_space<vmem>>, vector<1x2x512xf32>
    %34 = vector.shape_cast %33 : vector<1x2x512xf32> to vector<2x512xf32>
    %35 = vector.shape_cast %32 : vector<2x512xf32> to vector<1x2x512xf32>
    tpu.vector_store %arg3[%c3, %c0_19, %c0_20], %35 {strides = array<i32>} : memref<8x2x512xf32, #tpu.memory_space<vmem>>, vector<1x2x512xf32>,
    %36 = vector.extract_strided_slice %19 {offsets = [8, 0], sizes = [2, 512], strides = [1, 1]} : vector<16x512xf32> to vector<2x512xf32>
    %c4 = arith.constant 4 : index
    %c0_21 = arith.constant 0 : index
    %c0_22 = arith.constant 0 : index
    %37 = vector.load %arg3[%c4, %c0_21, %c0_22] : memref<8x2x512xf32, #tpu.memory_space<vmem>>, vector<1x2x512xf32>
    %38 = vector.shape_cast %37 : vector<1x2x512xf32> to vector<2x512xf32>
    %39 = vector.shape_cast %36 : vector<2x512xf32> to vector<1x2x512xf32>
    tpu.vector_store %arg3[%c4, %c0_21, %c0_22], %39 {strides = array<i32>} : memref<8x2x512xf32, #tpu.memory_space<vmem>>, vector<1x2x512xf32>,
    %40 = vector.extract_strided_slice %19 {offsets = [10, 0], sizes = [2, 512], strides = [1, 1]} : vector<16x512xf32> to vector<2x512xf32>
    %c5 = arith.constant 5 : index
    %c0_23 = arith.constant 0 : index
    %c0_24 = arith.constant 0 : index
    %41 = vector.load %arg3[%c5, %c0_23, %c0_24] : memref<8x2x512xf32, #tpu.memory_space<vmem>>, vector<1x2x512xf32>
    %42 = vector.shape_cast %41 : vector<1x2x512xf32> to vector<2x512xf32>
    %43 = vector.shape_cast %40 : vector<2x512xf32> to vector<1x2x512xf32>
    tpu.vector_store %arg3[%c5, %c0_23, %c0_24], %43 {strides = array<i32>} : memref<8x2x512xf32, #tpu.memory_space<vmem>>, vector<1x2x512xf32>,
    %44 = vector.extract_strided_slice %19 {offsets = [12, 0], sizes = [2, 512], strides = [1, 1]} : vector<16x512xf32> to vector<2x512xf32>
    %c6 = arith.constant 6 : index
    %c0_25 = arith.constant 0 : index
    %c0_26 = arith.constant 0 : index
    %45 = vector.load %arg3[%c6, %c0_25, %c0_26] : memref<8x2x512xf32, #tpu.memory_space<vmem>>, vector<1x2x512xf32>
    %46 = vector.shape_cast %45 : vector<1x2x512xf32> to vector<2x512xf32>
    %47 = vector.shape_cast %44 : vector<2x512xf32> to vector<1x2x512xf32>
    tpu.vector_store %arg3[%c6, %c0_25, %c0_26], %47 {strides = array<i32>} : memref<8x2x512xf32, #tpu.memory_space<vmem>>, vector<1x2x512xf32>,
    %48 = vector.extract_strided_slice %19 {offsets = [14, 0], sizes = [2, 512], strides = [1, 1]} : vector<16x512xf32> to vector<2x512xf32>
    %c7 = arith.constant 7 : index
    %c0_27 = arith.constant 0 : index
    %c0_28 = arith.constant 0 : index
    %49 = vector.load %arg3[%c7, %c0_27, %c0_28] : memref<8x2x512xf32, #tpu.memory_space<vmem>>, vector<1x2x512xf32>
    %50 = vector.shape_cast %49 : vector<1x2x512xf32> to vector<2x512xf32>
    %51 = vector.shape_cast %48 : vector<2x512xf32> to vector<1x2x512xf32>
    tpu.vector_store %arg3[%c7, %c0_27, %c0_28], %51 {strides = array<i32>} : memref<8x2x512xf32, #tpu.memory_space<vmem>>, vector<1x2x512xf32>,
    %c384 = arith.constant 384 : index
    %c0_29 = arith.constant 0 : index
    %52 = vector.load %arg1[%c384, %c0_29] : memref<672x512xf32, #tpu.memory_space<vmem>>, vector<128x512xf32>
    %cst_30 = arith.constant 0.000000e+00 : f32
    %53 = vector.broadcast %cst_30 : f32 to vector<2x128xf32>
    %cst_31 = arith.constant 0.000000e+00 : f32
    %54 = vector.broadcast %cst_31 : f32 to vector<2x128xf32>
    %c0_32 = arith.constant 0 : index
    %c0_33 = arith.constant 0 : index
    %c0_34 = arith.constant 0 : index
    %55 = vector.load %arg3[%c0_32, %c0_33, %c0_34] : memref<8x2x512xf32, #tpu.memory_space<vmem>>, vector<1x2x512xf32>
    %56 = vector.shape_cast %55 : vector<1x2x512xf32> to vector<2x512xf32>
    %cst_35 = arith.constant dense<0.000000e+00> : vector<2x512xf32>
    %57 = tpu.matmul %53, %52, %cst_35 {dimension_numbers = #tpu.dot_dimension_numbers<[1], [0], [0], [1], [0, 0, 1, 1], [], []>} : vector<2x128xf32>, vector<128x512xf32>, vector<2x512xf32> -> vector<2x512xf32>
    %58 = arith.addf %56, %57 : vector<2x512xf32>
    %59 = vector.extract_strided_slice %58 {offsets = [0, 0], sizes = [2, 384], strides = [1, 1]} : vector<2x512xf32> to vector<2x384xf32>
    %60 = arith.negf %59 : vector<2x384xf32>
    %61 = math.exp %60 : vector<2x384xf32>
    %cst_36 = arith.constant 1.000000e+00 : f32
    %62 = vector.broadcast %cst_36 : f32 to vector<2x384xf32>
    %63 = arith.addf %62, %61 : vector<2x384xf32>
    %64 = arith.divf %62, %63 : vector<2x384xf32>
    %65 = vector.extract_strided_slice %64 {offsets = [0, 0], sizes = [2, 128], strides = [1, 1]} : vector<2x384xf32> to vector<2x128xf32>
    %66 = vector.extract_strided_slice %64 {offsets = [0, 128], sizes = [2, 128], strides = [1, 1]} : vector<2x384xf32> to vector<2x128xf32>
    %67 = vector.extract_strided_slice %64 {offsets = [0, 256], sizes = [2, 128], strides = [1, 1]} : vector<2x384xf32> to vector<2x128xf32>
    %68 = vector.extract_strided_slice %58 {offsets = [0, 384], sizes = [2, 128], strides = [1, 1]} : vector<2x512xf32> to vector<2x128xf32>
    %69 = math.tanh %68 : vector<2x128xf32>
    %70 = arith.mulf %65, %54 : vector<2x128xf32>
    %71 = arith.mulf %66, %69 : vector<2x128xf32>
    %72 = arith.addf %70, %71 : vector<2x128xf32>
    %73 = math.tanh %72 : vector<2x128xf32>
    %74 = arith.mulf %67, %73 : vector<2x128xf32>
    %c1_37 = arith.constant 1 : index
    %c0_38 = arith.constant 0 : index
    %c0_39 = arith.constant 0 : index
    %75 = vector.load %arg3[%c1_37, %c0_38, %c0_39] : memref<8x2x512xf32, #tpu.memory_space<vmem>>, vector<1x2x512xf32>
    %76 = vector.shape_cast %75 : vector<1x2x512xf32> to vector<2x512xf32>
    %cst_40 = arith.constant dense<0.000000e+00> : vector<2x512xf32>
    %77 = tpu.matmul %74, %52, %cst_40 {dimension_numbers = #tpu.dot_dimension_numbers<[1], [0], [0], [1], [0, 0, 1, 1], [], []>} : vector<2x128xf32>, vector<128x512xf32>, vector<2x512xf32> -> vector<2x512xf32>
    %78 = arith.addf %76, %77 : vector<2x512xf32>
    %79 = vector.extract_strided_slice %78 {offsets = [0, 0], sizes = [2, 384], strides = [1, 1]} : vector<2x512xf32> to vector<2x384xf32>
    %80 = arith.negf %79 : vector<2x384xf32>
    %81 = math.exp %80 : vector<2x384xf32>
    %cst_41 = arith.constant 1.000000e+00 : f32
    %82 = vector.broadcast %cst_41 : f32 to vector<2x384xf32>
    %83 = arith.addf %82, %81 : vector<2x384xf32>
    %84 = arith.divf %82, %83 : vector<2x384xf32>
    %85 = vector.extract_strided_slice %84 {offsets = [0, 0], sizes = [2, 128], strides = [1, 1]} : vector<2x384xf32> to vector<2x128xf32>
    %86 = vector.extract_strided_slice %84 {offsets = [0, 128], sizes = [2, 128], strides = [1, 1]} : vector<2x384xf32> to vector<2x128xf32>
    %87 = vector.extract_strided_slice %84 {offsets = [0, 256], sizes = [2, 128], strides = [1, 1]} : vector<2x384xf32> to vector<2x128xf32>
    %88 = vector.extract_strided_slice %78 {offsets = [0, 384], sizes = [2, 128], strides = [1, 1]} : vector<2x512xf32> to vector<2x128xf32>
    %89 = math.tanh %88 : vector<2x128xf32>
    %90 = arith.mulf %85, %72 : vector<2x128xf32>
    %91 = arith.mulf %86, %89 : vector<2x128xf32>
    %92 = arith.addf %90, %91 : vector<2x128xf32>
    %93 = math.tanh %92 : vector<2x128xf32>
    %94 = arith.mulf %87, %93 : vector<2x128xf32>
    %c2_42 = arith.constant 2 : index
    %c0_43 = arith.constant 0 : index
    %c0_44 = arith.constant 0 : index
    %95 = vector.load %arg3[%c2_42, %c0_43, %c0_44] : memref<8x2x512xf32, #tpu.memory_space<vmem>>, vector<1x2x512xf32>
    %96 = vector.shape_cast %95 : vector<1x2x512xf32> to vector<2x512xf32>
    %cst_45 = arith.constant dense<0.000000e+00> : vector<2x512xf32>
    %97 = tpu.matmul %94, %52, %cst_45 {dimension_numbers = #tpu.dot_dimension_numbers<[1], [0], [0], [1], [0, 0, 1, 1], [], []>} : vector<2x128xf32>, vector<128x512xf32>, vector<2x512xf32> -> vector<2x512xf32>
    %98 = arith.addf %96, %97 : vector<2x512xf32>
    %99 = vector.extract_strided_slice %98 {offsets = [0, 0], sizes = [2, 384], strides = [1, 1]} : vector<2x512xf32> to vector<2x384xf32>
    %100 = arith.negf %99 : vector<2x384xf32>
    %101 = math.exp %100 : vector<2x384xf32>
    %cst_46 = arith.constant 1.000000e+00 : f32
    %102 = vector.broadcast %cst_46 : f32 to vector<2x384xf32>
    %103 = arith.addf %102, %101 : vector<2x384xf32>
    %104 = arith.divf %102, %103 : vector<2x384xf32>
    %105 = vector.extract_strided_slice %104 {offsets = [0, 0], sizes = [2, 128], strides = [1, 1]} : vector<2x384xf32> to vector<2x128xf32>
    %106 = vector.extract_strided_slice %104 {offsets = [0, 128], sizes = [2, 128], strides = [1, 1]} : vector<2x384xf32> to vector<2x128xf32>
    %107 = vector.extract_strided_slice %104 {offsets = [0, 256], sizes = [2, 128], strides = [1, 1]} : vector<2x384xf32> to vector<2x128xf32>
    %108 = vector.extract_strided_slice %98 {offsets = [0, 384], sizes = [2, 128], strides = [1, 1]} : vector<2x512xf32> to vector<2x128xf32>
    %109 = math.tanh %108 : vector<2x128xf32>
    %110 = arith.mulf %105, %92 : vector<2x128xf32>
    %111 = arith.mulf %106, %109 : vector<2x128xf32>
    %112 = arith.addf %110, %111 : vector<2x128xf32>
    %113 = math.tanh %112 : vector<2x128xf32>
    %114 = arith.mulf %107, %113 : vector<2x128xf32>
    %c3_47 = arith.constant 3 : index
    %c0_48 = arith.constant 0 : index
    %c0_49 = arith.constant 0 : index
    %115 = vector.load %arg3[%c3_47, %c0_48, %c0_49] : memref<8x2x512xf32, #tpu.memory_space<vmem>>, vector<1x2x512xf32>
    %116 = vector.shape_cast %115 : vector<1x2x512xf32> to vector<2x512xf32>
    %cst_50 = arith.constant dense<0.000000e+00> : vector<2x512xf32>
    %117 = tpu.matmul %114, %52, %cst_50 {dimension_numbers = #tpu.dot_dimension_numbers<[1], [0], [0], [1], [0, 0, 1, 1], [], []>} : vector<2x128xf32>, vector<128x512xf32>, vector<2x512xf32> -> vector<2x512xf32>
    %118 = arith.addf %116, %117 : vector<2x512xf32>
    %119 = vector.extract_strided_slice %118 {offsets = [0, 0], sizes = [2, 384], strides = [1, 1]} : vector<2x512xf32> to vector<2x384xf32>
    %120 = arith.negf %119 : vector<2x384xf32>
    %121 = math.exp %120 : vector<2x384xf32>
    %cst_51 = arith.constant 1.000000e+00 : f32
    %122 = vector.broadcast %cst_51 : f32 to vector<2x384xf32>
    %123 = arith.addf %122, %121 : vector<2x384xf32>
    %124 = arith.divf %122, %123 : vector<2x384xf32>
    %125 = vector.extract_strided_slice %124 {offsets = [0, 0], sizes = [2, 128], strides = [1, 1]} : vector<2x384xf32> to vector<2x128xf32>
    %126 = vector.extract_strided_slice %124 {offsets = [0, 128], sizes = [2, 128], strides = [1, 1]} : vector<2x384xf32> to vector<2x128xf32>
    %127 = vector.extract_strided_slice %124 {offsets = [0, 256], sizes = [2, 128], strides = [1, 1]} : vector<2x384xf32> to vector<2x128xf32>
    %128 = vector.extract_strided_slice %118 {offsets = [0, 384], sizes = [2, 128], strides = [1, 1]} : vector<2x512xf32> to vector<2x128xf32>
    %129 = math.tanh %128 : vector<2x128xf32>
    %130 = arith.mulf %125, %112 : vector<2x128xf32>
    %131 = arith.mulf %126, %129 : vector<2x128xf32>
    %132 = arith.addf %130, %131 : vector<2x128xf32>
    %133 = math.tanh %132 : vector<2x128xf32>
    %134 = arith.mulf %127, %133 : vector<2x128xf32>
    %c4_52 = arith.constant 4 : index
    %c0_53 = arith.constant 0 : index
    %c0_54 = arith.constant 0 : index
    %135 = vector.load %arg3[%c4_52, %c0_53, %c0_54] : memref<8x2x512xf32, #tpu.memory_space<vmem>>, vector<1x2x512xf32>
    %136 = vector.shape_cast %135 : vector<1x2x512xf32> to vector<2x512xf32>
    %cst_55 = arith.constant dense<0.000000e+00> : vector<2x512xf32>
    %137 = tpu.matmul %134, %52, %cst_55 {dimension_numbers = #tpu.dot_dimension_numbers<[1], [0], [0], [1], [0, 0, 1, 1], [], []>} : vector<2x128xf32>, vector<128x512xf32>, vector<2x512xf32> -> vector<2x512xf32>
    %138 = arith.addf %136, %137 : vector<2x512xf32>
    %139 = vector.extract_strided_slice %138 {offsets = [0, 0], sizes = [2, 384], strides = [1, 1]} : vector<2x512xf32> to vector<2x384xf32>
    %140 = arith.negf %139 : vector<2x384xf32>
    %141 = math.exp %140 : vector<2x384xf32>
    %cst_56 = arith.constant 1.000000e+00 : f32
    %142 = vector.broadcast %cst_56 : f32 to vector<2x384xf32>
    %143 = arith.addf %142, %141 : vector<2x384xf32>
    %144 = arith.divf %142, %143 : vector<2x384xf32>
    %145 = vector.extract_strided_slice %144 {offsets = [0, 0], sizes = [2, 128], strides = [1, 1]} : vector<2x384xf32> to vector<2x128xf32>
    %146 = vector.extract_strided_slice %144 {offsets = [0, 128], sizes = [2, 128], strides = [1, 1]} : vector<2x384xf32> to vector<2x128xf32>
    %147 = vector.extract_strided_slice %144 {offsets = [0, 256], sizes = [2, 128], strides = [1, 1]} : vector<2x384xf32> to vector<2x128xf32>
    %148 = vector.extract_strided_slice %138 {offsets = [0, 384], sizes = [2, 128], strides = [1, 1]} : vector<2x512xf32> to vector<2x128xf32>
    %149 = math.tanh %148 : vector<2x128xf32>
    %150 = arith.mulf %145, %132 : vector<2x128xf32>
    %151 = arith.mulf %146, %149 : vector<2x128xf32>
    %152 = arith.addf %150, %151 : vector<2x128xf32>
    %153 = math.tanh %152 : vector<2x128xf32>
    %154 = arith.mulf %147, %153 : vector<2x128xf32>
    %c5_57 = arith.constant 5 : index
    %c0_58 = arith.constant 0 : index
    %c0_59 = arith.constant 0 : index
    %155 = vector.load %arg3[%c5_57, %c0_58, %c0_59] : memref<8x2x512xf32, #tpu.memory_space<vmem>>, vector<1x2x512xf32>
    %156 = vector.shape_cast %155 : vector<1x2x512xf32> to vector<2x512xf32>
    %cst_60 = arith.constant dense<0.000000e+00> : vector<2x512xf32>
    %157 = tpu.matmul %154, %52, %cst_60 {dimension_numbers = #tpu.dot_dimension_numbers<[1], [0], [0], [1], [0, 0, 1, 1], [], []>} : vector<2x128xf32>, vector<128x512xf32>, vector<2x512xf32> -> vector<2x512xf32>
    %158 = arith.addf %156, %157 : vector<2x512xf32>
    %159 = vector.extract_strided_slice %158 {offsets = [0, 0], sizes = [2, 384], strides = [1, 1]} : vector<2x512xf32> to vector<2x384xf32>
    %160 = arith.negf %159 : vector<2x384xf32>
    %161 = math.exp %160 : vector<2x384xf32>
    %cst_61 = arith.constant 1.000000e+00 : f32
    %162 = vector.broadcast %cst_61 : f32 to vector<2x384xf32>
    %163 = arith.addf %162, %161 : vector<2x384xf32>
    %164 = arith.divf %162, %163 : vector<2x384xf32>
    %165 = vector.extract_strided_slice %164 {offsets = [0, 0], sizes = [2, 128], strides = [1, 1]} : vector<2x384xf32> to vector<2x128xf32>
    %166 = vector.extract_strided_slice %164 {offsets = [0, 128], sizes = [2, 128], strides = [1, 1]} : vector<2x384xf32> to vector<2x128xf32>
    %167 = vector.extract_strided_slice %164 {offsets = [0, 256], sizes = [2, 128], strides = [1, 1]} : vector<2x384xf32> to vector<2x128xf32>
    %168 = vector.extract_strided_slice %158 {offsets = [0, 384], sizes = [2, 128], strides = [1, 1]} : vector<2x512xf32> to vector<2x128xf32>
    %169 = math.tanh %168 : vector<2x128xf32>
    %170 = arith.mulf %165, %152 : vector<2x128xf32>
    %171 = arith.mulf %166, %169 : vector<2x128xf32>
    %172 = arith.addf %170, %171 : vector<2x128xf32>
    %173 = math.tanh %172 : vector<2x128xf32>
    %174 = arith.mulf %167, %173 : vector<2x128xf32>
    %c6_62 = arith.constant 6 : index
    %c0_63 = arith.constant 0 : index
    %c0_64 = arith.constant 0 : index
    %175 = vector.load %arg3[%c6_62, %c0_63, %c0_64] : memref<8x2x512xf32, #tpu.memory_space<vmem>>, vector<1x2x512xf32>
    %176 = vector.shape_cast %175 : vector<1x2x512xf32> to vector<2x512xf32>
    %cst_65 = arith.constant dense<0.000000e+00> : vector<2x512xf32>
    %177 = tpu.matmul %174, %52, %cst_65 {dimension_numbers = #tpu.dot_dimension_numbers<[1], [0], [0], [1], [0, 0, 1, 1], [], []>} : vector<2x128xf32>, vector<128x512xf32>, vector<2x512xf32> -> vector<2x512xf32>
    %178 = arith.addf %176, %177 : vector<2x512xf32>
    %179 = vector.extract_strided_slice %178 {offsets = [0, 0], sizes = [2, 384], strides = [1, 1]} : vector<2x512xf32> to vector<2x384xf32>
    %180 = arith.negf %179 : vector<2x384xf32>
    %181 = math.exp %180 : vector<2x384xf32>
    %cst_66 = arith.constant 1.000000e+00 : f32
    %182 = vector.broadcast %cst_66 : f32 to vector<2x384xf32>
    %183 = arith.addf %182, %181 : vector<2x384xf32>
    %184 = arith.divf %182, %183 : vector<2x384xf32>
    %185 = vector.extract_strided_slice %184 {offsets = [0, 0], sizes = [2, 128], strides = [1, 1]} : vector<2x384xf32> to vector<2x128xf32>
    %186 = vector.extract_strided_slice %184 {offsets = [0, 128], sizes = [2, 128], strides = [1, 1]} : vector<2x384xf32> to vector<2x128xf32>
    %187 = vector.extract_strided_slice %184 {offsets = [0, 256], sizes = [2, 128], strides = [1, 1]} : vector<2x384xf32> to vector<2x128xf32>
    %188 = vector.extract_strided_slice %178 {offsets = [0, 384], sizes = [2, 128], strides = [1, 1]} : vector<2x512xf32> to vector<2x128xf32>
    %189 = math.tanh %188 : vector<2x128xf32>
    %190 = arith.mulf %185, %172 : vector<2x128xf32>
    %191 = arith.mulf %186, %189 : vector<2x128xf32>
    %192 = arith.addf %190, %191 : vector<2x128xf32>
    %193 = math.tanh %192 : vector<2x128xf32>
    %194 = arith.mulf %187, %193 : vector<2x128xf32>
    %c7_67 = arith.constant 7 : index
    %c0_68 = arith.constant 0 : index
    %c0_69 = arith.constant 0 : index
    %195 = vector.load %arg3[%c7_67, %c0_68, %c0_69] : memref<8x2x512xf32, #tpu.memory_space<vmem>>, vector<1x2x512xf32>
    %196 = vector.shape_cast %195 : vector<1x2x512xf32> to vector<2x512xf32>
    %cst_70 = arith.constant dense<0.000000e+00> : vector<2x512xf32>
    %197 = tpu.matmul %194, %52, %cst_70 {dimension_numbers = #tpu.dot_dimension_numbers<[1], [0], [0], [1], [0, 0, 1, 1], [], []>} : vector<2x128xf32>, vector<128x512xf32>, vector<2x512xf32> -> vector<2x512xf32>
    %198 = arith.addf %196, %197 : vector<2x512xf32>
    %199 = vector.extract_strided_slice %198 {offsets = [0, 0], sizes = [2, 384], strides = [1, 1]} : vector<2x512xf32> to vector<2x384xf32>
    %200 = arith.negf %199 : vector<2x384xf32>
    %201 = math.exp %200 : vector<2x384xf32>
    %cst_71 = arith.constant 1.000000e+00 : f32
    %202 = vector.broadcast %cst_71 : f32 to vector<2x384xf32>
    %203 = arith.addf %202, %201 : vector<2x384xf32>
    %204 = arith.divf %202, %203 : vector<2x384xf32>
    %205 = vector.extract_strided_slice %204 {offsets = [0, 0], sizes = [2, 128], strides = [1, 1]} : vector<2x384xf32> to vector<2x128xf32>
    %206 = vector.extract_strided_slice %204 {offsets = [0, 128], sizes = [2, 128], strides = [1, 1]} : vector<2x384xf32> to vector<2x128xf32>
    %207 = vector.extract_strided_slice %204 {offsets = [0, 256], sizes = [2, 128], strides = [1, 1]} : vector<2x384xf32> to vector<2x128xf32>
    %208 = vector.extract_strided_slice %198 {offsets = [0, 384], sizes = [2, 128], strides = [1, 1]} : vector<2x512xf32> to vector<2x128xf32>
    %209 = math.tanh %208 : vector<2x128xf32>
    %210 = arith.mulf %205, %192 : vector<2x128xf32>
    %211 = arith.mulf %206, %209 : vector<2x128xf32>
    %212 = arith.addf %210, %211 : vector<2x128xf32>
    %213 = math.tanh %212 : vector<2x128xf32>
    %214 = arith.mulf %207, %213 : vector<2x128xf32>
    %cst_72 = arith.constant 0.000000e+00 : f32
    %215 = vector.broadcast %cst_72 : f32 to vector<2x128xf32>
    %216 = arith.maximumf %214, %215 : vector<2x128xf32>
    %c512 = arith.constant 512 : index
    %c0_73 = arith.constant 0 : index
    %217 = vector.load %arg1[%c512, %c0_73] : memref<672x512xf32, #tpu.memory_space<vmem>>, vector<128x128xf32>
    %cst_74 = arith.constant dense<0.000000e+00> : vector<2x128xf32>
    %218 = tpu.matmul %216, %217, %cst_74 {dimension_numbers = #tpu.dot_dimension_numbers<[1], [0], [0], [1], [0, 0, 1, 1], [], []>} : vector<2x128xf32>, vector<128x128xf32>, vector<2x128xf32> -> vector<2x128xf32>
    %c664 = arith.constant 664 : index
    %c0_75 = arith.constant 0 : index
    %219 = vector.load %arg1[%c664, %c0_75] : memref<672x512xf32, #tpu.memory_space<vmem>>, vector<1x128xf32>
    %220 = vector.broadcast %219 : vector<1x128xf32> to vector<2x128xf32>
    %221 = arith.addf %218, %220 : vector<2x128xf32>
    %c0_76 = arith.constant 0 : index
    %c0_77 = arith.constant 0 : index
    %222 = vector.load %arg2[%c0_76, %c0_77] : memref<2x128xf32, #tpu.memory_space<vmem>>, vector<2x128xf32>
    tpu.vector_store %arg2[%c0_76, %c0_77], %221 {strides = array<i32>} : memref<2x128xf32, #tpu.memory_space<vmem>>, vector<2x128xf32>,
    return
  }
}

</mosaic_0001>

<bundles_post_ra>
// kernel: forward.1
= control target key start
LH: loop header
LB: loop body
LE: loop exit
PB: predicated region body
PF: predicated region fallthrough
CT: control target
= control target key end

     0   :  { %7 = vsyncpa [#allocation4], 0  ;;  %s2527_s9 = smov [#allocation3]   ;;  %s3474_s0 = inlined_call_operand.vmem [shape: f32[16,128], index: 0, kind: input, shape index: {}]   ;;  %s3475_s1 = inlined_call_operand.hbm [shape: f32[672,512], index: 1, kind: input, shape index: {}]   ;;  %s3476_s2 = inlined_call_operand.vmem [shape: f32[2,128], index: 2, kind: output, shape index: {}]  }
   0x1   :  { %s15_s10 = sshll.u32 %s2527_s9, 4  ;;  %s16_s10 = int_to_ptr.vmem [resolvable:$true] %s15_s10 }
   0x2   :  { %s2513_s11 = scalar_lea.vmem %s16_s10, 43008  ;;  %p2518_p1 = scmp.lt.s32.totalorder %s16_s10, %s16_s10 }
   0x3   :  { %p2514_p0 = scmp.ne.s32.totalorder %s16_s10, %s2513_s11  ;;  %p2519_p2 = scmp.lt.s32.totalorder %s2513_s11, %s2513_s11 }
   0x5   :  { %p2520_p3 = por %p2519_p2, %p2518_p1 }
   0x7   :  { %p2521_p4 = pnand %p2520_p3, %p2514_p0 }
   0x9   :  { %2524 = shalt.err (!%p2521_p4)
}
   0xa   :  { %s2528_s12 = smov 512   ;;  %s2529_s13 = smov 32  }
   0xb   :  { %21 = dma.hbm_to_vmem [thread:$0]  %s3475_s1, 43008, %s16_s10, [#allocation4], %s2528_s12, %s2528_s12, %s2529_s13  }
   0xc   :  { %2525 = dma.done.wait [#allocation4], 43008  }
   0xd   :  { %2526 = vsyncadd [#allocation4], 4294924288  ;;  %v42_v0 = vld [vmem:[#allocation3 + $0x1e0] sm:$0xff]  ;;  %v26_v29 = vld [vmem:[%s3474_s0 + $0x8] sm:$0xff]  ;;  %vm2532_vm0 = vmmov 0  }
   0xe   :  { %v41_v1 = vld [vmem:[#allocation3 + $0x1c0] sm:$0xff]  ;;  %2266 = vmatprep.subr.mxu0 %v42_v0  ;;  %v276_v34 = vld [vmem:[#allocation3 + $0x5e8] sm:$0xff]  ;;  %v278_v35 = vld [vmem:[#allocation3 + $0x5f8] sm:$0xff] }
   0xf   :  { %2267 = vmatpush3.msra.mxu0 %v42_v0  ;;  %v40_v2 = vld [vmem:[#allocation3 + $0x1a0] sm:$0xff]  ;;  %v272_v37 = vld [vmem:[#allocation3 + $0x5c8] sm:$0xff] }
  0x10   :  { %2268 = vmatprep.subr.mxu0 %v41_v1  ;;  %v39_v3 = vld [vmem:[#allocation3 + $0x180] sm:$0xff]  ;;  %v268_v39 = vld [vmem:[#allocation3 + $0x5a8] sm:$0xff] }
  0x11   :  { %2269 = vmatpush3.msra.mxu0 %v41_v1  ;;  %v25_v4 = vld [vmem:[%s3474_s0] sm:$0xff]  ;;  %v264_v41 = vld [vmem:[#allocation3 + $0x588] sm:$0xff] }
  0x12   :  { %2270 = vmatprep.subr.mxu0 %v40_v2  ;;  %v38_v5 = vld [vmem:[#allocation3 + $0x160] sm:$0xff]  ;;  %2298 = vmatprep.mubr.f32.mxu0 %v25_v4  ;;  %v260_v43 = vld [vmem:[#allocation3 + $0x568] sm:$0xff]  ;;  %v277_v4 = vld [vmem:[#allocation3 + $0x5f0] sm:$0xff] }
  0x13   :  { %2271 = vmatpush3.msra.mxu0 %v40_v2  ;;  %v136_v6 = vld [vmem:[#allocation3 + $0x3e0] sm:$0xff]  ;;  %v256_v45 = vld [vmem:[#allocation3 + $0x548] sm:$0xff] }
  0x14   :  { %v135_v7 = vld [vmem:[#allocation3 + $0x3c0] sm:$0xff]  ;;  %2272 = vmatprep.subr.mxu0 %v39_v3  ;;  %2301 = vmatprep.subr.mxu1 %v136_v6  ;;  %v252_v47 = vld [vmem:[#allocation3 + $0x528] sm:$0xff] }
  0x15   :  { %2273 = vmatpush3.msra.mxu0 %v39_v3  ;;  %v37_v8 = vld [vmem:[#allocation3 + $0x140] sm:$0xff]  ;;  %2302 = vmatpush3.msra.mxu1 %v136_v6  ;;  %v248_v49 = vld [vmem:[#allocation3 + $0x508] sm:$0xff]  ;;  %v273_v6 = vld [vmem:[#allocation3 + $0x5d0] sm:$0xff] }
  0x16   :  { %v134_v9 = vld [vmem:[#allocation3 + $0x3a0] sm:$0xff]  ;;  %2274 = vmatprep.subr.mxu0 %v38_v5  ;;  %2303 = vmatprep.subr.mxu1 %v135_v7  ;;  %v244_v51 = vld [vmem:[#allocation3 + $0x4e8] sm:$0xff] }
  0x17   :  { %2275 = vmatpush3.msra.mxu0 %v38_v5  ;;  %v36_v10 = vld [vmem:[#allocation3 + $0x120] sm:$0xff]  ;;  %2304 = vmatpush3.msra.mxu1 %v135_v7  ;;  %v240_v53 = vld [vmem:[#allocation3 + $0x4c8] sm:$0xff]  ;;  %v274_v5 = vld [vmem:[#allocation3 + $0x5d8] sm:$0xff] }
  0x18   :  { %v133_v11 = vld [vmem:[#allocation3 + $0x380] sm:$0xff]  ;;  %2276 = vmatprep.subr.mxu0 %v37_v8  ;;  %2305 = vmatprep.subr.mxu1 %v134_v9  ;;  %v236_v55 = vld [vmem:[#allocation3 + $0x4a8] sm:$0xff]  ;;  %v270_v7 = vld [vmem:[#allocation3 + $0x5b8] sm:$0xff] }
  0x19   :  { %2277 = vmatpush3.msra.mxu0 %v37_v8  ;;  %v35_v12 = vld [vmem:[#allocation3 + $0x100] sm:$0xff]  ;;  %2306 = vmatpush3.msra.mxu1 %v134_v9  ;;  %v232_v57 = vld [vmem:[#allocation3 + $0x488] sm:$0xff]  ;;  %v269_v8 = vld [vmem:[#allocation3 + $0x5b0] sm:$0xff] }
  0x1a   :  { %v132_v13 = vld [vmem:[#allocation3 + $0x360] sm:$0xff]  ;;  %2278 = vmatprep.subr.mxu0 %v36_v10  ;;  %2307 = vmatprep.subr.mxu1 %v133_v11  ;;  %v228_v59 = vld [vmem:[#allocation3 + $0x468] sm:$0xff]  ;;  %v266_v9 = vld [vmem:[#allocation3 + $0x598] sm:$0xff] }
  0x1b   :  { %2279 = vmatpush3.msra.mxu0 %v36_v10  ;;  %v34_v14 = vld [vmem:[#allocation3 + $0xe0] sm:$0xff]  ;;  %2308 = vmatpush3.msra.mxu1 %v133_v11  ;;  %v265_v10 = vld [vmem:[#allocation3 + $0x590] sm:$0xff]  ;;  %v262_v11 = vld [vmem:[#allocation3 + $0x578] sm:$0xff] }
  0x1c   :  { %v131_v15 = vld [vmem:[#allocation3 + $0x340] sm:$0xff]  ;;  %2280 = vmatprep.subr.mxu0 %v35_v12  ;;  %2309 = vmatprep.subr.mxu1 %v132_v13 }
  0x1d   :  { %2281 = vmatpush3.msra.mxu0 %v35_v12  ;;  %v33_v16 = vld [vmem:[#allocation3 + $0xc0] sm:$0xff]  ;;  %2310 = vmatpush3.msra.mxu1 %v132_v13  ;;  %v261_v12 = vld [vmem:[#allocation3 + $0x570] sm:$0xff]  ;;  %v258_v13 = vld [vmem:[#allocation3 + $0x558] sm:$0xff] }
  0x1e   :  { %v130_v17 = vld [vmem:[#allocation3 + $0x320] sm:$0xff]  ;;  %2282 = vmatprep.subr.mxu0 %v34_v14  ;;  %2311 = vmatprep.subr.mxu1 %v131_v15 }
  0x1f   :  { %2283 = vmatpush3.msra.mxu0 %v34_v14  ;;  %v32_v18 = vld [vmem:[#allocation3 + $0xa0] sm:$0xff]  ;;  %2312 = vmatpush3.msra.mxu1 %v131_v15  ;;  %v257_v14 = vld [vmem:[#allocation3 + $0x550] sm:$0xff]  ;;  %v254_v15 = vld [vmem:[#allocation3 + $0x538] sm:$0xff] }
  0x20   :  { %v129_v19 = vld [vmem:[#allocation3 + $0x300] sm:$0xff]  ;;  %2284 = vmatprep.subr.mxu0 %v33_v16  ;;  %2313 = vmatprep.subr.mxu1 %v130_v17 }
  0x21   :  { %2285 = vmatpush3.msra.mxu0 %v33_v16  ;;  %v31_v20 = vld [vmem:[#allocation3 + $0x80] sm:$0xff]  ;;  %2314 = vmatpush3.msra.mxu1 %v130_v17  ;;  %v253_v16 = vld [vmem:[#allocation3 + $0x530] sm:$0xff]  ;;  %v250_v17 = vld [vmem:[#allocation3 + $0x518] sm:$0xff] }
  0x22   :  { %v128_v21 = vld [vmem:[#allocation3 + $0x2e0] sm:$0xff]  ;;  %2286 = vmatprep.subr.mxu0 %v32_v18  ;;  %2315 = vmatprep.subr.mxu1 %v129_v19 }
  0x23   :  { %2287 = vmatpush3.msra.mxu0 %v32_v18  ;;  %v30_v22 = vld [vmem:[#allocation3 + $0x60] sm:$0xff]  ;;  %2316 = vmatpush3.msra.mxu1 %v129_v19  ;;  %v249_v18 = vld [vmem:[#allocation3 + $0x510] sm:$0xff]  ;;  %v246_v19 = vld [vmem:[#allocation3 + $0x4f8] sm:$0xff] }
  0x24   :  { %v127_v23 = vld [vmem:[#allocation3 + $0x2c0] sm:$0xff]  ;;  %2288 = vmatprep.subr.mxu0 %v31_v20  ;;  %2317 = vmatprep.subr.mxu1 %v128_v21 }
  0x25   :  { %2289 = vmatpush3.msra.mxu0 %v31_v20  ;;  %v29_v24 = vld [vmem:[#allocation3 + $0x40] sm:$0xff]  ;;  %2318 = vmatpush3.msra.mxu1 %v128_v21  ;;  %v245_v20 = vld [vmem:[#allocation3 + $0x4f0] sm:$0xff]  ;;  %v242_v21 = vld [vmem:[#allocation3 + $0x4d8] sm:$0xff] }
  0x26   :  { %v126_v25 = vld [vmem:[#allocation3 + $0x2a0] sm:$0xff]  ;;  %2290 = vmatprep.subr.mxu0 %v30_v22  ;;  %2319 = vmatprep.subr.mxu1 %v127_v23 }
  0x27   :  { %2291 = vmatpush3.msra.mxu0 %v30_v22  ;;  %v28_v26 = vld [vmem:[#allocation3 + $0x20] sm:$0xff]  ;;  %2320 = vmatpush3.msra.mxu1 %v127_v23  ;;  %v241_v22 = vld [vmem:[#allocation3 + $0x4d0] sm:$0xff]  ;;  %v238_v23 = vld [vmem:[#allocation3 + $0x4b8] sm:$0xff] }
  0x28   :  { %v125_v27 = vld [vmem:[#allocation3 + $0x280] sm:$0xff]  ;;  %2292 = vmatprep.subr.mxu0 %v29_v24  ;;  %2321 = vmatprep.subr.mxu1 %v126_v25 }
  0x29   :  { %2293 = vmatpush3.msra.mxu0 %v29_v24  ;;  %v27_v28 = vld [vmem:[#allocation3] sm:$0xff]  ;;  %2322 = vmatpush3.msra.mxu1 %v126_v25  ;;  %v237_v24 = vld [vmem:[#allocation3 + $0x4b0] sm:$0xff]  ;;  %v234_v25 = vld [vmem:[#allocation3 + $0x498] sm:$0xff] }
  0x2a   :  { %2294 = vmatprep.subr.mxu0 %v28_v26  ;;  %2323 = vmatprep.subr.mxu1 %v125_v27  ;;  %v124_v30 = vld [vmem:[#allocation3 + $0x260] sm:$0xff] }
  0x2b   :  { %2295 = vmatpush3.msra.mxu0 %v28_v26  ;;  %2324 = vmatpush3.msra.mxu1 %v125_v27  ;;  %v123_v31 = vld [vmem:[#allocation3 + $0x240] sm:$0xff]  ;;  %v233_v26 = vld [vmem:[#allocation3 + $0x490] sm:$0xff]  ;;  %v230_v27 = vld [vmem:[#allocation3 + $0x478] sm:$0xff] }
  0x2c   :  { %2296 = vmatprep.subr.mxu0 %v27_v28  ;;  %2325 = vmatprep.subr.mxu1 %v124_v30  ;;  %v122_v32 = vld [vmem:[#allocation3 + $0x220] sm:$0xff] }
  0x2d   :  { %2297 = vmatpush3.msra.mxu0 %v27_v28  ;;  %2326 = vmatpush3.msra.mxu1 %v124_v30  ;;  %v121_v33 = vld [vmem:[#allocation3 + $0x200] sm:$0xff]  ;;  %v229_v28 = vld [vmem:[#allocation3 + $0x470] sm:$0xff]  ;;  %v226_v30 = vld [vmem:[#allocation3 + $0x458] sm:$0xff] }
  0x2e   :  { %2299 = vmatmul.mubr.f32.vlgmr.msra.gmra.mxu0 %v26_v29  ;;  %2327 = vmatprep.subr.mxu1 %v123_v31  ;;  %v275_v36 = vld [vmem:[#allocation3 + $0x5e0] sm:$0xff]  ;;  %v224_v29 = vld [vmem:[#allocation3 + $0x448] sm:$0xff] }
  0x2f   :  { %2328 = vmatpush3.msra.mxu1 %v123_v31  ;;  %302 = vmatprep.subr.mxu0 %v276_v34  ;;  %v271_v38 = vld [vmem:[#allocation3 + $0x5c0] sm:$0xff]  ;;  %v222_v34 = vld [vmem:[#allocation3 + $0x438] sm:$0xff] }
  0x30   :  { %2329 = vmatprep.subr.mxu1 %v122_v32  ;;  %303 = vmatpush1.msra.mxu0 %v275_v36  ;;  %v267_v40 = vld [vmem:[#allocation3 + $0x5a0] sm:$0xff]  ;;  %v221_v36 = vld [vmem:[#allocation3 + $0x430] sm:$0xff] }
  0x31   :  { %2330 = vmatpush3.msra.mxu1 %v122_v32  ;;  %304 = vmatprep.subr.mxu0 %v272_v37  ;;  %v263_v42 = vld [vmem:[#allocation3 + $0x580] sm:$0xff]  ;;  %v225_v32 = vld [vmem:[#allocation3 + $0x450] sm:$0xff]  ;;  %v216_v37 = vld [vmem:[#allocation3 + $0x408] sm:$0xff] }
  0x32   :  { %2331 = vmatprep.subr.mxu1 %v121_v33  ;;  %305 = vmatpush1.msra.mxu0 %v271_v38  ;;  %v259_v44 = vld [vmem:[#allocation3 + $0x560] sm:$0xff]  ;;  %v218_v38 = vld [vmem:[#allocation3 + $0x418] sm:$0xff] }
  0x33   :  { %2332 = vmatpush3.msra.mxu1 %v121_v33  ;;  %306 = vmatprep.subr.mxu0 %v268_v39  ;;  %v255_v46 = vld [vmem:[#allocation3 + $0x540] sm:$0xff]  ;;  %v220_v33 = vld [vmem:[#allocation3 + $0x428] sm:$0xff] }
  0x34   :  { %379 = vmatprep.subr.mxu1 %v278_v35  ;;  %307 = vmatpush1.msra.mxu0 %v267_v40  ;;  %v251_v48 = vld [vmem:[#allocation3 + $0x520] sm:$0xff]  ;;  %v217_v40 = vld [vmem:[#allocation3 + $0x410] sm:$0xff] }
  0x35   :  { %308 = vmatprep.subr.mxu0 %v264_v41  ;;  %v247_v50 = vld [vmem:[#allocation3 + $0x500] sm:$0xff]  ;;  %v2557_v41 = vld [vmem:[#allocation3 + $0x7e8] sm:$0xff] }
  0x36   :  { %309 = vmatpush1.msra.mxu0 %v263_v42  ;;  %v243_v52 = vld [vmem:[#allocation3 + $0x4e0] sm:$0xff]  ;;  %3584 = vst [vmem:[#allocation6_spill] sm:$0xff] %v2557_v41  ;;  %v2559_v42 = vld [vmem:[#allocation3 + $0x7f8] sm:$0xff] }
  0x37   :  { %310 = vmatprep.subr.mxu0 %v260_v43  ;;  %v239_v54 = vld [vmem:[#allocation3 + $0x4c0] sm:$0xff]  ;;  %3585 = vst [vmem:[#allocation7_spill] sm:$0xff] %v2559_v42  ;;  %v3477_v43 = vmov 0.0  }
  0x38   :  { %311 = vmatpush1.msra.mxu0 %v259_v44  ;;  %v235_v56 = vld [vmem:[#allocation3 + $0x4a0] sm:$0xff]  ;;  %366 = vmatprep.mubr.f32.mxu0 %v3477_v43 }
  0x39   :  { %312 = vmatprep.subr.mxu0 %v256_v45  ;;  %v231_v58 = vld [vmem:[#allocation3 + $0x480] sm:$0xff] }
  0x3a   :  { %313 = vmatpush1.msra.mxu0 %v255_v46  ;;  %v227_v60 = vld [vmem:[#allocation3 + $0x460] sm:$0xff] }
  0x3b   :  { %314 = vmatprep.subr.mxu0 %v252_v47  ;;  %v43_v61 = vld [vmem:[#allocation3 + $0xa00] ss:$0 sm:$0xff] }
  0x3c   :  { %315 = vmatpush1.msra.mxu0 %v251_v48  ;;  %v223_v31 = vld [vmem:[#allocation3 + $0x440] sm:$0xff] }
  0x3d   :  { %316 = vmatprep.subr.mxu0 %v248_v49  ;;  %v219_v35 = vld [vmem:[#allocation3 + $0x420] sm:$0xff] }
  0x3e   :  { %317 = vmatpush1.msra.mxu0 %v247_v50  ;;  %v215_v39 = vld [vmem:[#allocation3 + $0x400] sm:$0xff]  ;;  %v2567_v50 = vld [vmem:[#allocation3 + $0x7f0] sm:$0xff] }
  0x3f   :  { %318 = vmatprep.subr.mxu0 %v244_v51  ;;  %v137_v45 = vld [vmem:[#allocation3 + $0xa20] ss:$0 sm:$0xff]  ;;  %v2569_v51 = vld [vmem:[#allocation3 + $0x7c8] sm:$0xff] }
  0x40   :  { %319 = vmatpush1.msra.mxu0 %v243_v52  ;;  %v2565_v49 = vld [vmem:[#allocation3 + $0x7e0] sm:$0xff]  ;;  %v2571_v52 = vld [vmem:[#allocation3 + $0x7d8] sm:$0xff] }
  0x41   :  { %320 = vmatprep.subr.mxu0 %v240_v53 }
  0x42   :  { %321 = vmatpush1.msra.mxu0 %v239_v54  ;;  %v2573_v54 = vld [vmem:[#allocation3 + $0x7c0] sm:$0xff] }
  0x43   :  { %322 = vmatprep.subr.mxu0 %v236_v55  ;;  %v2575_v55 = vld [vmem:[#allocation3 + $0x7d0] sm:$0xff] }
  0x44   :  { %323 = vmatpush1.msra.mxu0 %v235_v56  ;;  %v2581_v56 = vld [vmem:[#allocation3 + $0x7a8] sm:$0xff] }
  0x45   :  { %324 = vmatprep.subr.mxu0 %v232_v57  ;;  %v2583_v57 = vld [vmem:[#allocation3 + $0x7b8] sm:$0xff] }
  0x46   :  { %325 = vmatpush1.msra.mxu0 %v231_v58 }
  0x47   :  { %326 = vmatprep.subr.mxu0 %v228_v59  ;;  %v2589_v59 = vld [vmem:[#allocation3 + $0x7a0] sm:$0xff] }
  0x48   :  { %327 = vmatpush1.msra.mxu0 %v227_v60  ;;  %v2591_v60 = vld [vmem:[#allocation3 + $0x7b0] sm:$0xff] }
  0x49   :  { %328 = vmatprep.subr.mxu0 %v224_v29  ;;  %v2689_v29 = vld [vmem:[#allocation3 + $0x688] sm:$0xff] }
  0x4a   :  { %329 = vmatpush1.msra.mxu0 %v223_v31  ;;  %3590 = vst [vmem:[#allocation12_spill] sm:$0xff] %v2689_v29  ;;  %v2695_v31 = vld [vmem:[#allocation3 + $0x680] sm:$0xff] }
  0x4b   :  { %330 = vmatprep.subr.mxu0 %v220_v33  ;;  %3592 = vst [vmem:[#allocation14_spill] sm:$0xff] %v2695_v31  ;;  %v2701_v33 = vld [vmem:[#allocation3 + $0x668] sm:$0xff] }
  0x4c   :  { %331 = vmatpush1.msra.mxu0 %v219_v35  ;;  %3594 = vst [vmem:[#allocation16_spill] sm:$0xff] %v2701_v33  ;;  %v2707_v35 = vld [vmem:[#allocation3 + $0x660] sm:$0xff] }
  0x4d   :  { %332 = vmatprep.subr.mxu0 %v216_v37  ;;  %3596 = vst [vmem:[#allocation18_spill] sm:$0xff] %v2707_v35  ;;  %v2713_v37 = vld [vmem:[#allocation3 + $0x648] sm:$0xff] }
  0x4e   :  { %333 = vmatpush1.msra.mxu0 %v215_v39  ;;  %3598 = vst [vmem:[#allocation20_spill] sm:$0xff] %v2713_v37  ;;  %v2719_v39 = vld [vmem:[#allocation3 + $0x640] sm:$0xff] }
  0x4f   :  { %624 = vmatprep.subr.mxu0 %v2557_v41  ;;  %3600 = vst [vmem:[#allocation22_spill] sm:$0xff] %v2719_v39 }
  0xee   :  { %v2300_v62 = vpop.f32.mrf.mxu0 }
  0xef   :  { %v116_v63 = vadd.f32 %v2300_v62, %v43_v61  ;;  %v2597_v62 = vld [vmem:[#allocation3 + $0x798] sm:$0xff] }
  0xf0   :  { %v110_v0 = vpop.f32.mrf.mxu0 }
  0xf1   :  { %v111_v1 = vadd.f32 %v110_v0, %v43_v61  ;;  %v120_v3 = vmax.f32 %v116_v63, 0.0  ;;  %v2595_v61 = vld [vmem:[#allocation3 + $0x788] sm:$0xff]  ;;  %v2599_v63 = vld [vmem:[#allocation3 + $0x780] sm:$0xff]  ;;  %v2601_v0 = vld [vmem:[#allocation3 + $0x790] sm:$0xff] }
  0xf3   :  { %v119_v2 = vmax.f32 %v111_v1, 0.0  ;;  %v2605_v1 = vld [vmem:[#allocation3 + $0x768] sm:$0xff] }
  0xf5   :  { %2333 = vmatprep.mubr.f32.mxu1 %v119_v2  ;;  %v2607_v2 = vld [vmem:[#allocation3 + $0x778] sm:$0xff] }
  0xf6   :  { %2334 = vmatmul.mubr.f32.vlgmr.msra.gmra.mxu1 %v120_v3  ;;  %v2611_v3 = vld [vmem:[#allocation3 + $0x760] sm:$0xff] }
  0xf7   :  { %380 = vmatpush1.msra.mxu1 %v277_v4  ;;  %443 = vmatprep.mubr.f32.mxu1 %v3477_v43  ;;  %v2613_v4 = vld [vmem:[#allocation3 + $0x770] sm:$0xff] }
  0xf8   :  { %381 = vmatprep.subr.mxu1 %v274_v5  ;;  %v2617_v5 = vld [vmem:[#allocation3 + $0x748] sm:$0xff] }
  0xf9   :  { %382 = vmatpush1.msra.mxu1 %v273_v6  ;;  %v2619_v6 = vld [vmem:[#allocation3 + $0x758] sm:$0xff] }
  0xfa   :  { %383 = vmatprep.subr.mxu1 %v270_v7  ;;  %v2623_v7 = vld [vmem:[#allocation3 + $0x740] sm:$0xff] }
  0xfb   :  { %384 = vmatpush1.msra.mxu1 %v269_v8  ;;  %v2625_v8 = vld [vmem:[#allocation3 + $0x750] sm:$0xff] }
  0xfc   :  { %385 = vmatprep.subr.mxu1 %v266_v9  ;;  %v2629_v9 = vld [vmem:[#allocation3 + $0x728] sm:$0xff] }
  0xfd   :  { %386 = vmatpush1.msra.mxu1 %v265_v10  ;;  %v2631_v10 = vld [vmem:[#allocation3 + $0x738] sm:$0xff] }
  0xfe   :  { %387 = vmatprep.subr.mxu1 %v262_v11  ;;  %v2635_v11 = vld [vmem:[#allocation3 + $0x720] sm:$0xff] }
  0xff   :  { %388 = vmatpush1.msra.mxu1 %v261_v12  ;;  %v2637_v12 = vld [vmem:[#allocation3 + $0x730] sm:$0xff] }
 0x100   :  { %389 = vmatprep.subr.mxu1 %v258_v13  ;;  %v2641_v13 = vld [vmem:[#allocation3 + $0x708] sm:$0xff] }
 0x101   :  { %390 = vmatpush1.msra.mxu1 %v257_v14  ;;  %v2643_v14 = vld [vmem:[#allocation3 + $0x718] sm:$0xff] }
 0x102   :  { %391 = vmatprep.subr.mxu1 %v254_v15  ;;  %v2647_v15 = vld [vmem:[#allocation3 + $0x700] sm:$0xff] }
 0x103   :  { %392 = vmatpush1.msra.mxu1 %v253_v16  ;;  %v2649_v16 = vld [vmem:[#allocation3 + $0x710] sm:$0xff] }
 0x104   :  { %393 = vmatprep.subr.mxu1 %v250_v17  ;;  %v2653_v17 = vld [vmem:[#allocation3 + $0x6e8] sm:$0xff] }
 0x105   :  { %394 = vmatpush1.msra.mxu1 %v249_v18  ;;  %v2655_v18 = vld [vmem:[#allocation3 + $0x6f8] sm:$0xff] }
 0x106   :  { %395 = vmatprep.subr.mxu1 %v246_v19  ;;  %v2659_v19 = vld [vmem:[#allocation3 + $0x6e0] sm:$0xff] }
 0x107   :  { %396 = vmatpush1.msra.mxu1 %v245_v20  ;;  %v2661_v20 = vld [vmem:[#allocation3 + $0x6f0] sm:$0xff] }
 0x108   :  { %397 = vmatprep.subr.mxu1 %v242_v21  ;;  %v2665_v21 = vld [vmem:[#allocation3 + $0x6c8] sm:$0xff] }
 0x109   :  { %398 = vmatpush1.msra.mxu1 %v241_v22  ;;  %v2667_v22 = vld [vmem:[#allocation3 + $0x6d8] sm:$0xff] }
 0x10a   :  { %399 = vmatprep.subr.mxu1 %v238_v23  ;;  %v2671_v23 = vld [vmem:[#allocation3 + $0x6c0] sm:$0xff] }
 0x10b   :  { %400 = vmatpush1.msra.mxu1 %v237_v24  ;;  %v2673_v24 = vld [vmem:[#allocation3 + $0x6d0] sm:$0xff] }
 0x10c   :  { %401 = vmatprep.subr.mxu1 %v234_v25  ;;  %v2677_v25 = vld [vmem:[#allocation3 + $0x6a8] sm:$0xff] }
 0x10d   :  { %402 = vmatpush1.msra.mxu1 %v233_v26  ;;  %3586 = vst [vmem:[#allocation8_spill] sm:$0xff] %v2677_v25  ;;  %v2679_v26 = vld [vmem:[#allocation3 + $0x6b8] sm:$0xff] }
 0x10e   :  { %403 = vmatprep.subr.mxu1 %v230_v27  ;;  %3587 = vst [vmem:[#allocation9_spill] sm:$0xff] %v2679_v26  ;;  %v2683_v27 = vld [vmem:[#allocation3 + $0x6a0] sm:$0xff] }
 0x10f   :  { %404 = vmatpush1.msra.mxu1 %v229_v28  ;;  %3588 = vst [vmem:[#allocation10_spill] sm:$0xff] %v2683_v27  ;;  %v2685_v28 = vld [vmem:[#allocation3 + $0x6b0] sm:$0xff] }
 0x110   :  { %405 = vmatprep.subr.mxu1 %v226_v30  ;;  %3589 = vst [vmem:[#allocation11_spill] sm:$0xff] %v2685_v28  ;;  %v2691_v30 = vld [vmem:[#allocation3 + $0x698] sm:$0xff] }
 0x111   :  { %406 = vmatpush1.msra.mxu1 %v225_v32  ;;  %3591 = vst [vmem:[#allocation13_spill] sm:$0xff] %v2691_v30  ;;  %v2697_v32 = vld [vmem:[#allocation3 + $0x690] sm:$0xff] }
 0x112   :  { %407 = vmatprep.subr.mxu1 %v222_v34  ;;  %3593 = vst [vmem:[#allocation15_spill] sm:$0xff] %v2697_v32  ;;  %v2703_v34 = vld [vmem:[#allocation3 + $0x678] sm:$0xff] }
 0x113   :  { %408 = vmatpush1.msra.mxu1 %v221_v36  ;;  %3595 = vst [vmem:[#allocation17_spill] sm:$0xff] %v2703_v34  ;;  %v2709_v36 = vld [vmem:[#allocation3 + $0x670] sm:$0xff] }
 0x114   :  { %409 = vmatprep.subr.mxu1 %v218_v38  ;;  %3597 = vst [vmem:[#allocation19_spill] sm:$0xff] %v2709_v36  ;;  %v2715_v38 = vld [vmem:[#allocation3 + $0x658] sm:$0xff] }
 0x115   :  { %410 = vmatpush1.msra.mxu1 %v217_v40  ;;  %3599 = vst [vmem:[#allocation21_spill] sm:$0xff] %v2715_v38  ;;  %v2721_v40 = vld [vmem:[#allocation3 + $0x650] sm:$0xff] }
 0x116   :  { %695 = vmatprep.subr.mxu1 %v2559_v42  ;;  %3601 = vst [vmem:[#allocation23_spill] sm:$0xff] %v2721_v40 }
 0x1b6   :  { %v2335_v44 = vpop.f32.mrf.mxu1 }
 0x1b7   :  { %v210_v53 = vadd.f32 %v2335_v44, %v137_v45  ;;  %v2725_v44 = vld [vmem:[#allocation3 + $0x628] sm:$0xff] }
 0x1b8   :  { %v204_v46 = vpop.f32.mrf.mxu1  ;;  %3602 = vst [vmem:[#allocation24_spill] sm:$0xff] %v2725_v44 }
 0x1b9   :  { %v205_v47 = vadd.f32 %v204_v46, %v137_v45  ;;  %v214_v58 = vmax.f32 %v210_v53, 0.0  ;;  %v2727_v45 = vld [vmem:[#allocation3 + $0x638] sm:$0xff]  ;;  %v2731_v46 = vld [vmem:[#allocation3 + $0x620] sm:$0xff] }
 0x1ba   :  { %3603 = vst [vmem:[#allocation25_spill] sm:$0xff] %v2727_v45  ;;  %3604 = vst [vmem:[#allocation26_spill] sm:$0xff] %v2731_v46  ;;  %v2739_v53 = vld [vmem:[#allocation3 + $0x618] sm:$0xff] }
 0x1bb   :  { %v213_v48 = vmax.f32 %v205_v47, 0.0  ;;  %v2733_v47 = vld [vmem:[#allocation3 + $0x630] sm:$0xff]  ;;  %3607 = vst [vmem:[#allocation29_spill] sm:$0xff] %v2739_v53 }
 0x1bc   :  { %3605 = vst [vmem:[#allocation27_spill] sm:$0xff] %v2733_v47 }
 0x1bd   :  { %367 = vmatmul.mubr.f32.vlgmr.msra.gmra.mxu0 %v213_v48  ;;  %444 = vmatmul.mubr.f32.vlgmr.msra.gmra.mxu1 %v213_v48  ;;  %v2737_v48 = vld [vmem:[#allocation3 + $0x608] sm:$0xff] }
 0x1be   :  { %625 = vmatpush1.msra.mxu0 %v2565_v49  ;;  %696 = vmatpush1.msra.mxu1 %v2567_v50  ;;  %3606 = vst [vmem:[#allocation28_spill] sm:$0xff] %v2737_v48 }
 0x1bf   :  { %626 = vmatprep.subr.mxu0 %v2569_v51  ;;  %697 = vmatprep.subr.mxu1 %v2571_v52 }
 0x1c0   :  { %627 = vmatpush1.msra.mxu0 %v2573_v54  ;;  %698 = vmatpush1.msra.mxu1 %v2575_v55 }
 0x1c1   :  { %372 = vmatprep.mubr.f32.mxu0 %v3477_v43  ;;  %449 = vmatprep.mubr.f32.mxu1 %v3477_v43  ;;  %v2747_v43 = vld [vmem:[#allocation3 + $0x610] sm:$0xff] }
 0x1c2   :  { %628 = vmatprep.subr.mxu0 %v2581_v56  ;;  %699 = vmatprep.subr.mxu1 %v2583_v57  ;;  %3609 = vst [vmem:[#allocation31_spill] sm:$0xff] %v2747_v43 }
 0x1c3   :  { %373 = vmatmul.mubr.f32.gmra.mxu0 %v214_v58  ;;  %450 = vmatmul.mubr.f32.gmra.mxu1 %v214_v58  ;;  %v2743_v58 = vld [vmem:[#allocation3 + $0x600] sm:$0xff] }
 0x1c4   :  { %629 = vmatpush1.msra.mxu0 %v2589_v59  ;;  %700 = vmatpush1.msra.mxu1 %v2591_v60  ;;  %3608 = vst [vmem:[#allocation30_spill] sm:$0xff] %v2743_v58 }
 0x1c5   :  { %630 = vmatprep.subr.mxu0 %v2595_v61  ;;  %701 = vmatprep.subr.mxu1 %v2597_v62 }
 0x1c6   :  { %631 = vmatpush1.msra.mxu0 %v2599_v63  ;;  %702 = vmatpush1.msra.mxu1 %v2601_v0 }
 0x1c7   :  { %632 = vmatprep.subr.mxu0 %v2605_v1  ;;  %703 = vmatprep.subr.mxu1 %v2607_v2 }
 0x1c8   :  { %633 = vmatpush1.msra.mxu0 %v2611_v3  ;;  %704 = vmatpush1.msra.mxu1 %v2613_v4 }
 0x1c9   :  { %634 = vmatprep.subr.mxu0 %v2617_v5  ;;  %705 = vmatprep.subr.mxu1 %v2619_v6 }
 0x1ca   :  { %635 = vmatpush1.msra.mxu0 %v2623_v7  ;;  %706 = vmatpush1.msra.mxu1 %v2625_v8 }
 0x1cb   :  { %636 = vmatprep.subr.mxu0 %v2629_v9  ;;  %707 = vmatprep.subr.mxu1 %v2631_v10 }
 0x1cc   :  { %637 = vmatpush1.msra.mxu0 %v2635_v11  ;;  %708 = vmatpush1.msra.mxu1 %v2637_v12 }
 0x1cd   :  { %638 = vmatprep.subr.mxu0 %v2641_v13  ;;  %709 = vmatprep.subr.mxu1 %v2643_v14 }
 0x1ce   :  { %639 = vmatpush1.msra.mxu0 %v2647_v15  ;;  %710 = vmatpush1.msra.mxu1 %v2649_v16 }
 0x1cf   :  { %640 = vmatprep.subr.mxu0 %v2653_v17  ;;  %711 = vmatprep.subr.mxu1 %v2655_v18 }
 0x1d0   :  { %641 = vmatpush1.msra.mxu0 %v2659_v19  ;;  %712 = vmatpush1.msra.mxu1 %v2661_v20 }
 0x1d1   :  { %642 = vmatprep.subr.mxu0 %v2665_v21  ;;  %713 = vmatprep.subr.mxu1 %v2667_v22 }
 0x1d2   :  { %643 = vmatpush1.msra.mxu0 %v2671_v23  ;;  %714 = vmatpush1.msra.mxu1 %v2673_v24 }
 0x1d3   :  { %644 = vmatprep.subr.mxu0 %v2677_v25  ;;  %715 = vmatprep.subr.mxu1 %v2679_v26 }
 0x1d4   :  { %645 = vmatpush1.msra.mxu0 %v2683_v27  ;;  %716 = vmatpush1.msra.mxu1 %v2685_v28 }
 0x1d5   :  { %646 = vmatprep.subr.mxu0 %v2689_v29  ;;  %717 = vmatprep.subr.mxu1 %v2691_v30 }
 0x1d6   :  { %647 = vmatpush1.msra.mxu0 %v2695_v31  ;;  %718 = vmatpush1.msra.mxu1 %v2697_v32 }
 0x1d7   :  { %648 = vmatprep.subr.mxu0 %v2701_v33  ;;  %719 = vmatprep.subr.mxu1 %v2703_v34 }
 0x1d8   :  { %649 = vmatpush1.msra.mxu0 %v2707_v35  ;;  %720 = vmatpush1.msra.mxu1 %v2709_v36 }
 0x1d9   :  { %650 = vmatprep.subr.mxu0 %v2713_v37  ;;  %721 = vmatprep.subr.mxu1 %v2715_v38 }
 0x1da   :  { %651 = vmatpush1.msra.mxu0 %v2719_v39  ;;  %722 = vmatpush1.msra.mxu1 %v2721_v40  ;;  %v3610_v40 = vmov 0.0  }
 0x1db   :  { %652 = vmatprep.subr.mxu0 %v2725_v44  ;;  %723 = vmatprep.subr.mxu1 %v2727_v45 }
 0x1dc   :  { %653 = vmatpush1.msra.mxu0 %v2731_v46  ;;  %724 = vmatpush1.msra.mxu1 %v2733_v47 }
 0x1dd   :  { %654 = vmatprep.subr.mxu0 %v2737_v48  ;;  %725 = vmatprep.subr.mxu1 %v2739_v53 }
 0x1de   :  { %655 = vmatpush1.msra.mxu0 %v2743_v58  ;;  %688 = vmatprep.mubr.f32.mxu0 %v3610_v40 }
 0x1df   :  { %726 = vmatpush1.msra.mxu1 %v2747_v43  ;;  %759 = vmatprep.mubr.f32.mxu1 %v3610_v40 }
 0x1e0   :  { %689 = vmatmul.mubr.f32.vlgmr.msra.gmra.mxu0 %v3610_v40  ;;  %760 = vmatmul.mubr.f32.vlgmr.msra.gmra.mxu1 %v3610_v40 }
 0x1e1   :  { %810 = vmatprep.subr.mxu0 %v2557_v41  ;;  %881 = vmatprep.subr.mxu1 %v2559_v42 }
 0x1e2   :  { %811 = vmatpush1.msra.mxu0 %v2565_v49  ;;  %882 = vmatpush1.msra.mxu1 %v2567_v50 }
 0x1e3   :  { %812 = vmatprep.subr.mxu0 %v2569_v51  ;;  %883 = vmatprep.subr.mxu1 %v2571_v52 }
 0x1e4   :  { %813 = vmatpush1.msra.mxu0 %v2573_v54  ;;  %884 = vmatpush1.msra.mxu1 %v2575_v55 }
 0x1e5   :  { %814 = vmatprep.subr.mxu0 %v2581_v56  ;;  %885 = vmatprep.subr.mxu1 %v2583_v57 }
 0x1e6   :  { %815 = vmatpush1.msra.mxu0 %v2589_v59  ;;  %886 = vmatpush1.msra.mxu1 %v2591_v60 }
 0x1e7   :  { %816 = vmatprep.subr.mxu0 %v2595_v61  ;;  %887 = vmatprep.subr.mxu1 %v2597_v62 }
 0x1e8   :  { %817 = vmatpush1.msra.mxu0 %v2599_v63  ;;  %888 = vmatpush1.msra.mxu1 %v2601_v0 }
 0x1e9   :  { %818 = vmatprep.subr.mxu0 %v2605_v1  ;;  %889 = vmatprep.subr.mxu1 %v2607_v2 }
 0x1ea   :  { %819 = vmatpush1.msra.mxu0 %v2611_v3  ;;  %890 = vmatpush1.msra.mxu1 %v2613_v4 }
 0x1eb   :  { %820 = vmatprep.subr.mxu0 %v2617_v5  ;;  %891 = vmatprep.subr.mxu1 %v2619_v6 }
 0x1ec   :  { %821 = vmatpush1.msra.mxu0 %v2623_v7  ;;  %892 = vmatpush1.msra.mxu1 %v2625_v8 }
 0x1ed   :  { %822 = vmatprep.subr.mxu0 %v2629_v9  ;;  %893 = vmatprep.subr.mxu1 %v2631_v10 }
 0x1ee   :  { %823 = vmatpush1.msra.mxu0 %v2635_v11  ;;  %894 = vmatpush1.msra.mxu1 %v2637_v12 }
 0x1ef   :  { %824 = vmatprep.subr.mxu0 %v2641_v13  ;;  %895 = vmatprep.subr.mxu1 %v2643_v14 }
 0x1f0   :  { %825 = vmatpush1.msra.mxu0 %v2647_v15  ;;  %896 = vmatpush1.msra.mxu1 %v2649_v16 }
 0x1f1   :  { %826 = vmatprep.subr.mxu0 %v2653_v17  ;;  %897 = vmatprep.subr.mxu1 %v2655_v18 }
 0x1f2   :  { %827 = vmatpush1.msra.mxu0 %v2659_v19  ;;  %898 = vmatpush1.msra.mxu1 %v2661_v20 }
 0x1f3   :  { %828 = vmatprep.subr.mxu0 %v2665_v21  ;;  %899 = vmatprep.subr.mxu1 %v2667_v22 }
 0x1f4   :  { %829 = vmatpush1.msra.mxu0 %v2671_v23  ;;  %900 = vmatpush1.msra.mxu1 %v2673_v24 }
 0x1f5   :  { %830 = vmatprep.subr.mxu0 %v2677_v25  ;;  %901 = vmatprep.subr.mxu1 %v2679_v26 }
 0x1f6   :  { %831 = vmatpush1.msra.mxu0 %v2683_v27  ;;  %902 = vmatpush1.msra.mxu1 %v2685_v28 }
 0x1f7   :  { %832 = vmatprep.subr.mxu0 %v2689_v29  ;;  %903 = vmatprep.subr.mxu1 %v2691_v30  ;;  %v3611_v29 = vld [vmem:[#allocation23_spill] sm:$0xff] }
 0x1f8   :  { %833 = vmatpush1.msra.mxu0 %v2695_v31  ;;  %904 = vmatpush1.msra.mxu1 %v2697_v32 }
 0x1f9   :  { %834 = vmatprep.subr.mxu0 %v2701_v33  ;;  %905 = vmatprep.subr.mxu1 %v2703_v34 }
 0x1fa   :  { %835 = vmatpush1.msra.mxu0 %v2707_v35  ;;  %906 = vmatpush1.msra.mxu1 %v2709_v36 }
 0x1fb   :  { %836 = vmatprep.subr.mxu0 %v2713_v37  ;;  %907 = vmatprep.subr.mxu1 %v2715_v38  ;;  %v280_v38 = vld [vmem:[#allocation3 + $0xa40] ss:$8 sm:$0xf] }
 0x1fc   :  { %837 = vmatpush1.msra.mxu0 %v2719_v39  ;;  %908 = vmatpush1.msra.mxu1 %v3611_v29 }
 0x1fd   :  { %838 = vmatprep.subr.mxu0 %v2725_v44  ;;  %909 = vmatprep.subr.mxu1 %v2727_v45  ;;  %v282_v45 = vlaneseq  ;;  %v2531_v44 = vmov 1983009808  }
 0x1fe   :  { %839 = vmatpush1.msra.mxu0 %v2731_v46  ;;  %910 = vmatpush1.msra.mxu1 %v2733_v47  ;;  %v463_v47 = vunpack.c.l.s4 %v2531_v44 }
 0x1ff   :  { %840 = vmatprep.subr.mxu0 %v2737_v48  ;;  %911 = vmatprep.subr.mxu1 %v2739_v53  ;;  %v283_v46 = vshrl.u32 %v282_v45, 7 }
 0x200   :  { %841 = vmatpush1.msra.mxu0 %v2743_v58  ;;  %874 = vmatprep.mubr.f32.mxu0 %v3610_v40  ;;  %v464_v58 = vunpack.c.0.s8 %v463_v47 }
 0x201   :  { %912 = vmatpush1.msra.mxu1 %v2747_v43  ;;  %945 = vmatprep.mubr.f32.mxu1 %v3610_v40  ;;  %v284_v29 = vsub.s32 0, %v283_v46  ;;  %v292_v48 = vsub.s32 2, %v283_v46  ;;  %v288_v39 = vsub.s32 1, %v283_v46  ;;  %v296_v53 = vsub.s32 3, %v283_v46 }
 0x202   :  { %996 = vmatprep.subr.mxu0 %v2557_v41  ;;  %1067 = vmatprep.subr.mxu1 %v2559_v42  ;;  %v2825_v33 = vsub.s32 %v464_v58, %v283_v46 }
 0x203   :  { %v285_v37 = vrot.slane %v280_v38, %v284_v29  ;;  %v293_v36 = vrot.slane %v280_v38, %v292_v48  ;;  %v289_v35 = vrot.slane %v280_v38, %v288_v39  ;;  %v297_v43 = vrot.slane %v280_v38, %v296_v53 }
 0x27d   :  { %v368_v34 = vpop.f32.mrf.mxu0  ;;  %v445_v40 = vpop.f32.mrf.mxu1 }
 0x27e   :  { %v369_v32 = vadd.f32 %v368_v34, %v285_v37  ;;  %v446_v45 = vadd.f32 %v445_v40, %v293_v36 }
 0x27f   :  { %v370_v41 = vpop.f32.mrf.mxu0  ;;  %v447_v42 = vpop.f32.mrf.mxu1 }
 0x280   :  { %v371_v31 = vadd.f32 %v370_v41, %v289_v35  ;;  %v448_v44 = vadd.f32 %v447_v42, %v297_v43 }
 0x282   :  { %v460_v30 = vcombine.low %v369_v32, %v371_v31  ;;  %v483_v28 = vcombine.high %v369_v32, %v371_v31  ;;  %v461_v27 = vcombine.low %v446_v45, %v448_v44  ;;  %v484_v26 = vcombine.high %v446_v45, %v448_v44 }
 0x283   :  { %v374_v25 = vpop.f32.mrf.mxu0  ;;  %v451_v47 = vpop.f32.mrf.mxu1 }
 0x284   :  { %v2828_v29 = vrot.slane %v460_v30, %v2825_v33  ;;  %v2831_v38 = vrot.slane %v483_v28, %v2825_v33  ;;  %v2834_v39 = vrot.slane %v461_v27, %v2825_v33  ;;  %v2837_v34 = vrot.slane %v484_v26, %v2825_v33 }
 0x285   :  { %v375_v41 = vadd.f32 %v374_v25, %v285_v37  ;;  %v452_v42 = vadd.f32 %v451_v47, %v293_v36  ;;  %v376_v40 = vpop.f32.mrf.mxu0  ;;  %v453_v31 = vpop.f32.mrf.mxu1 }
 0x286   :  { %3612 = vst [vmem:[#allocation32_spill] sm:$0xff] %v2831_v38  ;;  %3613 = vst [vmem:[#allocation33_spill] sm:$0xff] %v2837_v34  ;;  %v377_v46 = vadd.f32 %v376_v40, %v289_v35  ;;  %v454_v48 = vadd.f32 %v453_v31, %v297_v43  ;;  %v3638_v34 = vld [vmem:[#allocation28_spill] sm:$0xff]  ;;  %v3639_v38 = vld [vmem:[#allocation29_spill] sm:$0xff] }
 0x288   :  { %v511_v27 = vcombine.low %v375_v41, %v377_v46  ;;  %v535_v53 = vcombine.high %v375_v41, %v377_v46  ;;  %v512_v58 = vcombine.low %v452_v42, %v454_v48  ;;  %v536_v26 = vcombine.high %v452_v42, %v454_v48 }
 0x28a   :  { %v2846_v25 = vrot.slane %v511_v27, %v2825_v33  ;;  %v2849_v36 = vrot.slane %v535_v53, %v2825_v33  ;;  %v2852_v37 = vrot.slane %v512_v58, %v2825_v33  ;;  %v2855_v45 = vrot.slane %v536_v26, %v2825_v33 }
 0x28b   :  { %v476_v58 = vcombine.low %v2828_v29, %v2834_v39 }
 0x28c   :  { %3614 = vst [vmem:[#allocation34_spill] sm:$0xff] %v2846_v25  ;;  %3615 = vst [vmem:[#allocation35_spill] sm:$0xff] %v2849_v36  ;;  %v3635_v36 = vld [vmem:[#allocation25_spill] sm:$0xff]  ;;  %v3637_v25 = vld [vmem:[#allocation27_spill] sm:$0xff] }
 0x28d   :  { %3616 = vst [vmem:[#allocation36_spill] sm:$0xff] %v2852_v37  ;;  %3617 = vst [vmem:[#allocation37_spill] sm:$0xff] %v2855_v45  ;;  %v3634_v45 = vld [vmem:[#allocation24_spill] sm:$0xff]  ;;  %v3636_v37 = vld [vmem:[#allocation26_spill] sm:$0xff] }
 0x2a0   :  { %v690_v41 = vpop.f32.mrf.mxu0  ;;  %v761_v42 = vpop.f32.mrf.mxu1 }
 0x2a2   :  { %v692_v40 = vpop.f32.mrf.mxu0  ;;  %v763_v31 = vpop.f32.mrf.mxu1 }
 0x2a3   :  { %v770_v46 = vcombine.low %v690_v41, %v692_v40  ;;  %v771_v48 = vcombine.low %v761_v42, %v763_v31 }
 0x2a5   :  { %v778_v27 = vrot.slane %v770_v46, %v2825_v33  ;;  %v785_v53 = vrot.slane %v771_v48, %v2825_v33 }
 0x2a7   :  { %v786_v26 = vcombine.low %v778_v27, %v785_v53  ;;  %v3625_v53 = vld [vmem:[#allocation15_spill] sm:$0xff] }
 0x2a9   :  { %v788_v43 = vadd.f32 %v786_v26, %v476_v58  ;;  %v3626_v58 = vld [vmem:[#allocation16_spill] sm:$0xff]  ;;  %v3627_v26 = vld [vmem:[#allocation17_spill] sm:$0xff] }
 0x2ab   :  { %v2205_v35 = vmul.f32 -1.442695, %v788_v43  ;;  %v796_v47 = vrot.slane %v788_v43, 6  ;;  %v3622_v43 = vld [vmem:[#allocation12_spill] sm:$0xff] }
 0x2ad   :  { %2377 = vpow2.f32 %v2205_v35  ;;  %v3621_v35 = vld [vmem:[#allocation11_spill] sm:$0xff] }
 0x2ba   :  { %v2378_v44 = vpop.eup %2377 }
 0x2bb   :  { %v792_v28 = vadd.f32 1.0, %v2378_v44  ;;  %v3623_v44 = vld [vmem:[#allocation13_spill] sm:$0xff] }
 0x2bd   :  { %2379 = vrcp.f32 %v792_v28  ;;  %v3620_v28 = vld [vmem:[#allocation10_spill] sm:$0xff] }
 0x2be   :  { %2381 = vtanh.f32 %v796_v47  ;;  %v3624_v47 = vld [vmem:[#allocation14_spill] sm:$0xff] }
 0x2ca   :  { %v2380_v30 = vpop.eup %2379 }
 0x2cb   :  { %v801_v32 = vrot.slane %v2380_v30, 2  ;;  %v2382_v41 = vpop.eup %2381  ;;  %v799_v40 = vmul.f32 0.0, %v2380_v30  ;;  %v806_v46 = vrot.slane %v2380_v30, 4  ;;  %v3619_v30 = vld [vmem:[#allocation9_spill] sm:$0xff] }
 0x2cd   :  { %v803_v42 = vmul.f32 %v2382_v41, %v801_v32  ;;  %v3618_v32 = vld [vmem:[#allocation8_spill] sm:$0xff]  ;;  %v3628_v41 = vld [vmem:[#allocation18_spill] sm:$0xff] }
 0x2cf   :  { %v2869_v31 = vadd.f32 %v803_v42, %v799_v40  ;;  %v3629_v42 = vld [vmem:[#allocation19_spill] sm:$0xff]  ;;  %v3630_v40 = vld [vmem:[#allocation20_spill] sm:$0xff] }
 0x2d1   :  { %2383 = vtanh.f32 %v2869_v31 }
 0x2de   :  { %v2384_v48 = vpop.eup %2383 }
 0x2df   :  { %v808_v27 = vmul.f32 %v2384_v48, %v806_v46  ;;  %v3631_v46 = vld [vmem:[#allocation21_spill] sm:$0xff]  ;;  %v3632_v48 = vld [vmem:[#allocation22_spill] sm:$0xff] }
 0x2e1   :  { %875 = vmatmul.mubr.f32.vlgmr.msra.gmra.mxu0 %v808_v27  ;;  %946 = vmatmul.mubr.f32.vlgmr.msra.gmra.mxu1 %v808_v27  ;;  %v3633_v27 = vld [vmem:[#allocation23_spill] sm:$0xff] }
 0x2e2   :  { %997 = vmatpush1.msra.mxu0 %v2565_v49  ;;  %1068 = vmatpush1.msra.mxu1 %v2567_v50 }
 0x2e3   :  { %998 = vmatprep.subr.mxu0 %v2569_v51  ;;  %1069 = vmatprep.subr.mxu1 %v2571_v52 }
 0x2e4   :  { %999 = vmatpush1.msra.mxu0 %v2573_v54  ;;  %1070 = vmatpush1.msra.mxu1 %v2575_v55 }
 0x2e5   :  { %1000 = vmatprep.subr.mxu0 %v2581_v56  ;;  %1071 = vmatprep.subr.mxu1 %v2583_v57 }
 0x2e6   :  { %1001 = vmatpush1.msra.mxu0 %v2589_v59  ;;  %1072 = vmatpush1.msra.mxu1 %v2591_v60 }
 0x2e7   :  { %1002 = vmatprep.subr.mxu0 %v2595_v61  ;;  %1073 = vmatprep.subr.mxu1 %v2597_v62 }
 0x2e8   :  { %1003 = vmatpush1.msra.mxu0 %v2599_v63  ;;  %1074 = vmatpush1.msra.mxu1 %v2601_v0 }
 0x2e9   :  { %1004 = vmatprep.subr.mxu0 %v2605_v1  ;;  %1075 = vmatprep.subr.mxu1 %v2607_v2 }
 0x2ea   :  { %1005 = vmatpush1.msra.mxu0 %v2611_v3  ;;  %1076 = vmatpush1.msra.mxu1 %v2613_v4 }
 0x2eb   :  { %1006 = vmatprep.subr.mxu0 %v2617_v5  ;;  %1077 = vmatprep.subr.mxu1 %v2619_v6 }
 0x2ec   :  { %1007 = vmatpush1.msra.mxu0 %v2623_v7  ;;  %1078 = vmatpush1.msra.mxu1 %v2625_v8 }
 0x2ed   :  { %1008 = vmatprep.subr.mxu0 %v2629_v9  ;;  %1079 = vmatprep.subr.mxu1 %v2631_v10 }
 0x2ee   :  { %1009 = vmatpush1.msra.mxu0 %v2635_v11  ;;  %1080 = vmatpush1.msra.mxu1 %v2637_v12 }
 0x2ef   :  { %1010 = vmatprep.subr.mxu0 %v2641_v13  ;;  %1081 = vmatprep.subr.mxu1 %v2643_v14 }
 0x2f0   :  { %1011 = vmatpush1.msra.mxu0 %v2647_v15  ;;  %1082 = vmatpush1.msra.mxu1 %v2649_v16 }
 0x2f1   :  { %1012 = vmatprep.subr.mxu0 %v2653_v17  ;;  %1083 = vmatprep.subr.mxu1 %v2655_v18 }
 0x2f2   :  { %1013 = vmatpush1.msra.mxu0 %v2659_v19  ;;  %1084 = vmatpush1.msra.mxu1 %v2661_v20 }
 0x2f3   :  { %1014 = vmatprep.subr.mxu0 %v2665_v21  ;;  %1085 = vmatprep.subr.mxu1 %v2667_v22 }
 0x2f4   :  { %1015 = vmatpush1.msra.mxu0 %v2671_v23  ;;  %1086 = vmatpush1.msra.mxu1 %v2673_v24 }
 0x2f5   :  { %1016 = vmatprep.subr.mxu0 %v3618_v32  ;;  %1087 = vmatprep.subr.mxu1 %v3619_v30 }
 0x2f6   :  { %1017 = vmatpush1.msra.mxu0 %v3620_v28  ;;  %1088 = vmatpush1.msra.mxu1 %v3621_v35 }
 0x2f7   :  { %1018 = vmatprep.subr.mxu0 %v3622_v43  ;;  %1089 = vmatprep.subr.mxu1 %v3623_v44 }
 0x2f8   :  { %1019 = vmatpush1.msra.mxu0 %v3624_v47  ;;  %1090 = vmatpush1.msra.mxu1 %v3625_v53 }
 0x2f9   :  { %1020 = vmatprep.subr.mxu0 %v3626_v58  ;;  %1091 = vmatprep.subr.mxu1 %v3627_v26 }
 0x2fa   :  { %1021 = vmatpush1.msra.mxu0 %v3628_v41  ;;  %1092 = vmatpush1.msra.mxu1 %v3629_v42  ;;  %v3640_v42 = vld [vmem:[#allocation30_spill] sm:$0xff] }
 0x2fb   :  { %1022 = vmatprep.subr.mxu0 %v3630_v40  ;;  %1093 = vmatprep.subr.mxu1 %v3631_v46  ;;  %v3641_v40 = vmov 0.0   ;;  %v3642_v46 = vld [vmem:[#allocation31_spill] sm:$0xff] }
 0x2fc   :  { %1023 = vmatpush1.msra.mxu0 %v3632_v48  ;;  %1094 = vmatpush1.msra.mxu1 %v3633_v27  ;;  %v3643_v27 = vld [vmem:[#allocation6_spill] sm:$0xff] }
 0x2fd   :  { %1024 = vmatprep.subr.mxu0 %v3634_v45  ;;  %1095 = vmatprep.subr.mxu1 %v3635_v36  ;;  %v3644_v45 = vld [vmem:[#allocation7_spill] sm:$0xff] }
 0x2fe   :  { %1025 = vmatpush1.msra.mxu0 %v3636_v37  ;;  %1096 = vmatpush1.msra.mxu1 %v3637_v25 }
 0x2ff   :  { %1026 = vmatprep.subr.mxu0 %v3638_v34  ;;  %1097 = vmatprep.subr.mxu1 %v3639_v38 }
 0x300   :  { %1027 = vmatpush1.msra.mxu0 %v3640_v42  ;;  %1060 = vmatprep.mubr.f32.mxu0 %v3641_v40 }
 0x301   :  { %1098 = vmatpush1.msra.mxu1 %v3642_v46  ;;  %1131 = vmatprep.mubr.f32.mxu1 %v3641_v40  ;;  %v3645_v46 = vcombine.high %v2828_v29, %v2834_v39 }
 0x302   :  { %1182 = vmatprep.subr.mxu0 %v3643_v27  ;;  %1253 = vmatprep.subr.mxu1 %v3644_v45 }
 0x3a1   :  { %v876_v36 = vpop.f32.mrf.mxu0  ;;  %v947_v37 = vpop.f32.mrf.mxu1 }
 0x3a3   :  { %v878_v48 = vpop.f32.mrf.mxu0  ;;  %v949_v25 = vpop.f32.mrf.mxu1 }
 0x3a4   :  { %v956_v41 = vcombine.low %v876_v36, %v878_v48  ;;  %v957_v34 = vcombine.low %v947_v37, %v949_v25  ;;  %v3657_v48 = vld [vmem:[#allocation24_spill] sm:$0xff] }
 0x3a6   :  { %v964_v38 = vrot.slane %v956_v41, %v2825_v33  ;;  %v971_v42 = vrot.slane %v957_v34, %v2825_v33  ;;  %v3646_v34 = vld [vmem:[#allocation13_spill] sm:$0xff] }
 0x3a8   :  { %v972_v26 = vcombine.low %v964_v38, %v971_v42  ;;  %v3654_v42 = vld [vmem:[#allocation21_spill] sm:$0xff] }
 0x3aa   :  { %v974_v58 = vadd.f32 %v972_v26, %v3645_v46  ;;  %v3653_v26 = vld [vmem:[#allocation20_spill] sm:$0xff]  ;;  %v3656_v46 = vld [vmem:[#allocation23_spill] sm:$0xff] }
 0x3ac   :  { %v2206_v40 = vmul.f32 -1.442695, %v974_v58  ;;  %v982_v45 = vrot.slane %v974_v58, 6  ;;  %v3652_v58 = vld [vmem:[#allocation19_spill] sm:$0xff] }
 0x3ae   :  { %2385 = vpow2.f32 %v2206_v40  ;;  %v3655_v40 = vld [vmem:[#allocation22_spill] sm:$0xff] }
 0x3bb   :  { %v2386_v27 = vpop.eup %2385 }
 0x3bc   :  { %v978_v53 = vadd.f32 1.0, %v2386_v27  ;;  %v3658_v27 = vld [vmem:[#allocation25_spill] sm:$0xff] }
 0x3be   :  { %2387 = vrcp.f32 %v978_v53  ;;  %v3651_v53 = vld [vmem:[#allocation18_spill] sm:$0xff] }
 0x3bf   :  { %2389 = vtanh.f32 %v982_v45  ;;  %v3647_v45 = vld [vmem:[#allocation14_spill] sm:$0xff] }
 0x3cb   :  { %v2388_v47 = vpop.eup %2387 }
 0x3cc   :  { %v987_v44 = vrot.slane %v2388_v47, 2  ;;  %v2390_v36 = vpop.eup %2389  ;;  %v985_v37 = vmul.f32 %v2388_v47, %v2869_v31  ;;  %v992_v38 = vrot.slane %v2388_v47, 4  ;;  %v3648_v31 = vld [vmem:[#allocation15_spill] sm:$0xff]  ;;  %v3650_v47 = vld [vmem:[#allocation17_spill] sm:$0xff] }
 0x3ce   :  { %v989_v25 = vmul.f32 %v2390_v36, %v987_v44  ;;  %v3649_v44 = vld [vmem:[#allocation16_spill] sm:$0xff]  ;;  %v3659_v36 = vld [vmem:[#allocation26_spill] sm:$0xff] }
 0x3d0   :  { %v2944_v41 = vadd.f32 %v989_v25, %v985_v37  ;;  %v3660_v25 = vld [vmem:[#allocation27_spill] sm:$0xff]  ;;  %v3661_v37 = vld [vmem:[#allocation28_spill] sm:$0xff] }
 0x3d2   :  { %2391 = vtanh.f32 %v2944_v41 }
 0x3df   :  { %v2392_v29 = vpop.eup %2391 }
 0x3e0   :  { %v994_v39 = vmul.f32 %v2392_v29, %v992_v38  ;;  %v3662_v38 = vld [vmem:[#allocation29_spill] sm:$0xff]  ;;  %v3663_v29 = vld [vmem:[#allocation30_spill] sm:$0xff] }
 0x3e2   :  { %1061 = vmatmul.mubr.f32.vlgmr.msra.gmra.mxu0 %v994_v39  ;;  %1132 = vmatmul.mubr.f32.vlgmr.msra.gmra.mxu1 %v994_v39  ;;  %v3664_v39 = vmov 0.0  }
 0x3e3   :  { %1183 = vmatpush1.msra.mxu0 %v2565_v49  ;;  %1254 = vmatpush1.msra.mxu1 %v2567_v50 }
 0x3e4   :  { %1184 = vmatprep.subr.mxu0 %v2569_v51  ;;  %1255 = vmatprep.subr.mxu1 %v2571_v52 }
 0x3e5   :  { %1185 = vmatpush1.msra.mxu0 %v2573_v54  ;;  %1256 = vmatpush1.msra.mxu1 %v2575_v55 }
 0x3e6   :  { %1186 = vmatprep.subr.mxu0 %v2581_v56  ;;  %1257 = vmatprep.subr.mxu1 %v2583_v57 }
 0x3e7   :  { %1187 = vmatpush1.msra.mxu0 %v2589_v59  ;;  %1258 = vmatpush1.msra.mxu1 %v2591_v60 }
 0x3e8   :  { %1188 = vmatprep.subr.mxu0 %v2595_v61  ;;  %1259 = vmatprep.subr.mxu1 %v2597_v62 }
 0x3e9   :  { %1189 = vmatpush1.msra.mxu0 %v2599_v63  ;;  %1260 = vmatpush1.msra.mxu1 %v2601_v0 }
 0x3ea   :  { %1190 = vmatprep.subr.mxu0 %v2605_v1  ;;  %1261 = vmatprep.subr.mxu1 %v2607_v2 }
 0x3eb   :  { %1191 = vmatpush1.msra.mxu0 %v2611_v3  ;;  %1262 = vmatpush1.msra.mxu1 %v2613_v4 }
 0x3ec   :  { %1192 = vmatprep.subr.mxu0 %v2617_v5  ;;  %1263 = vmatprep.subr.mxu1 %v2619_v6 }
 0x3ed   :  { %1193 = vmatpush1.msra.mxu0 %v2623_v7  ;;  %1264 = vmatpush1.msra.mxu1 %v2625_v8 }
 0x3ee   :  { %1194 = vmatprep.subr.mxu0 %v2629_v9  ;;  %1265 = vmatprep.subr.mxu1 %v2631_v10 }
 0x3ef   :  { %1195 = vmatpush1.msra.mxu0 %v2635_v11  ;;  %1266 = vmatpush1.msra.mxu1 %v2637_v12 }
 0x3f0   :  { %1196 = vmatprep.subr.mxu0 %v2641_v13  ;;  %1267 = vmatprep.subr.mxu1 %v2643_v14 }
 0x3f1   :  { %1197 = vmatpush1.msra.mxu0 %v2647_v15  ;;  %1268 = vmatpush1.msra.mxu1 %v2649_v16 }
 0x3f2   :  { %1198 = vmatprep.subr.mxu0 %v2653_v17  ;;  %1269 = vmatprep.subr.mxu1 %v2655_v18 }
 0x3f3   :  { %1199 = vmatpush1.msra.mxu0 %v2659_v19  ;;  %1270 = vmatpush1.msra.mxu1 %v2661_v20 }
 0x3f4   :  { %1200 = vmatprep.subr.mxu0 %v2665_v21  ;;  %1271 = vmatprep.subr.mxu1 %v2667_v22 }
 0x3f5   :  { %1201 = vmatpush1.msra.mxu0 %v2671_v23  ;;  %1272 = vmatpush1.msra.mxu1 %v2673_v24 }
 0x3f6   :  { %1202 = vmatprep.subr.mxu0 %v3618_v32  ;;  %1273 = vmatprep.subr.mxu1 %v3619_v30 }
 0x3f7   :  { %1203 = vmatpush1.msra.mxu0 %v3620_v28  ;;  %1274 = vmatpush1.msra.mxu1 %v3621_v35 }
 0x3f8   :  { %1204 = vmatprep.subr.mxu0 %v3622_v43  ;;  %1275 = vmatprep.subr.mxu1 %v3646_v34 }
 0x3f9   :  { %1205 = vmatpush1.msra.mxu0 %v3647_v45  ;;  %1276 = vmatpush1.msra.mxu1 %v3648_v31 }
 0x3fa   :  { %1206 = vmatprep.subr.mxu0 %v3649_v44  ;;  %1277 = vmatprep.subr.mxu1 %v3650_v47  ;;  %v3669_v47 = vld [vmem:[#allocation33_spill] sm:$0xff] }
 0x3fb   :  { %1207 = vmatpush1.msra.mxu0 %v3651_v53  ;;  %1278 = vmatpush1.msra.mxu1 %v3652_v58  ;;  %v3668_v53 = vld [vmem:[#allocation32_spill] sm:$0xff] }
 0x3fc   :  { %1208 = vmatprep.subr.mxu0 %v3653_v26  ;;  %1279 = vmatprep.subr.mxu1 %v3654_v42  ;;  %v3665_v42 = vld [vmem:[#allocation31_spill] sm:$0xff] }
 0x3fd   :  { %1209 = vmatpush1.msra.mxu0 %v3655_v40  ;;  %1280 = vmatpush1.msra.mxu1 %v3656_v46  ;;  %v3666_v46 = vld [vmem:[#allocation6_spill] sm:$0xff] }
 0x3fe   :  { %1210 = vmatprep.subr.mxu0 %v3657_v48  ;;  %1281 = vmatprep.subr.mxu1 %v3658_v27  ;;  %v3667_v48 = vld [vmem:[#allocation7_spill] sm:$0xff] }
 0x3ff   :  { %1211 = vmatpush1.msra.mxu0 %v3659_v36  ;;  %1282 = vmatpush1.msra.mxu1 %v3660_v25 }
 0x400   :  { %1212 = vmatprep.subr.mxu0 %v3661_v37  ;;  %1283 = vmatprep.subr.mxu1 %v3662_v38 }
 0x401   :  { %1213 = vmatpush1.msra.mxu0 %v3663_v29  ;;  %1246 = vmatprep.mubr.f32.mxu0 %v3664_v39 }
 0x402   :  { %1284 = vmatpush1.msra.mxu1 %v3665_v42  ;;  %1317 = vmatprep.mubr.f32.mxu1 %v3664_v39  ;;  %v3670_v42 = vcombine.low %v3668_v53, %v3669_v47 }
 0x403   :  { %1368 = vmatprep.subr.mxu0 %v3666_v46  ;;  %1439 = vmatprep.subr.mxu1 %v3667_v48 }
 0x4a2   :  { %v1062_v27 = vpop.f32.mrf.mxu0  ;;  %v1133_v36 = vpop.f32.mrf.mxu1 }
 0x4a4   :  { %v1064_v40 = vpop.f32.mrf.mxu0  ;;  %v1135_v25 = vpop.f32.mrf.mxu1 }
 0x4a5   :  { %v1142_v26 = vcombine.low %v1062_v27, %v1064_v40  ;;  %v1143_v37 = vcombine.low %v1133_v36, %v1135_v25 }
 0x4a7   :  { %v1150_v38 = vrot.slane %v1142_v26, %v2825_v33  ;;  %v1157_v29 = vrot.slane %v1143_v37, %v2825_v33 }
 0x4a9   :  { %v1158_v58 = vcombine.low %v1150_v38, %v1157_v29  ;;  %v3116_v38 = vld [vmem:[#allocation3 + $0x7d0] sm:$0xff]  ;;  %v3119_v29 = vld [vmem:[#allocation3 + $0x7a8] sm:$0xff] }
 0x4ab   :  { %v1160_v44 = vadd.f32 %v1158_v58, %v3670_v42  ;;  %v3113_v42 = vld [vmem:[#allocation3 + $0x7c0] sm:$0xff] }
 0x4ad   :  { %v2207_v39 = vmul.f32 -1.442695, %v1160_v44  ;;  %v1168_v48 = vrot.slane %v1160_v44, 6  ;;  %v3104_v44 = vld [vmem:[#allocation3 + $0x7f0] sm:$0xff] }
 0x4af   :  { %2393 = vpow2.f32 %v2207_v39  ;;  %v3122_v39 = vld [vmem:[#allocation3 + $0x7b8] sm:$0xff] }
 0x4bc   :  { %v2394_v46 = vpop.eup %2393 }
 0x4bd   :  { %v1164_v31 = vadd.f32 1.0, %v2394_v46  ;;  %v3125_v46 = vld [vmem:[#allocation3 + $0x7a0] sm:$0xff] }
 0x4bf   :  { %2395 = vrcp.f32 %v1164_v31  ;;  %v3101_v31 = vld [vmem:[#allocation3 + $0x7e0] sm:$0xff] }
 0x4c0   :  { %2397 = vtanh.f32 %v1168_v48  ;;  %v3128_v48 = vld [vmem:[#allocation3 + $0x7b0] sm:$0xff] }
 0x4cc   :  { %v2396_v45 = vpop.eup %2395 }
 0x4cd   :  { %v1173_v34 = vrot.slane %v2396_v45, 2  ;;  %v2398_v40 = vpop.eup %2397  ;;  %v1171_v26 = vmul.f32 %v2396_v45, %v2944_v41  ;;  %v1178_v25 = vrot.slane %v2396_v45, 4 }
 0x4cf   :  { %v1175_v27 = vmul.f32 %v2398_v40, %v1173_v34  ;;  %v3131_v40 = vld [vmem:[#allocation3 + $0x788] sm:$0xff] }
 0x4d1   :  { %v3019_v36 = vadd.f32 %v1175_v27, %v1171_v26  ;;  %v3134_v27 = vld [vmem:[#allocation3 + $0x798] sm:$0xff]  ;;  %v3137_v26 = vld [vmem:[#allocation3 + $0x780] sm:$0xff] }
 0x4d3   :  { %2399 = vtanh.f32 %v3019_v36 }
 0x4e0   :  { %v2400_v37 = vpop.eup %2399 }
 0x4e1   :  { %v1180_v58 = vmul.f32 %v2400_v37, %v1178_v25  ;;  %v3143_v25 = vld [vmem:[#allocation3 + $0x768] sm:$0xff]  ;;  %v3146_v37 = vld [vmem:[#allocation3 + $0x778] sm:$0xff] }
 0x4e3   :  { %1247 = vmatmul.mubr.f32.vlgmr.msra.gmra.mxu0 %v1180_v58  ;;  %1318 = vmatmul.mubr.f32.vlgmr.msra.gmra.mxu1 %v1180_v58  ;;  %v3149_v58 = vld [vmem:[#allocation3 + $0x760] sm:$0xff] }
 0x4e4   :  { %1369 = vmatpush1.msra.mxu0 %v2565_v49  ;;  %1440 = vmatpush1.msra.mxu1 %v2567_v50  ;;  %v3671_v49 = vld [vmem:[#allocation13_spill] sm:$0xff]  ;;  %v3672_v50 = vld [vmem:[#allocation14_spill] sm:$0xff] }
 0x4e5   :  { %1370 = vmatprep.subr.mxu0 %v2569_v51  ;;  %1441 = vmatprep.subr.mxu1 %v2571_v52  ;;  %v3673_v51 = vld [vmem:[#allocation15_spill] sm:$0xff]  ;;  %v3674_v52 = vld [vmem:[#allocation16_spill] sm:$0xff] }
 0x4e6   :  { %1371 = vmatpush1.msra.mxu0 %v2573_v54  ;;  %1442 = vmatpush1.msra.mxu1 %v2575_v55  ;;  %v3675_v54 = vld [vmem:[#allocation17_spill] sm:$0xff]  ;;  %v3676_v55 = vld [vmem:[#allocation18_spill] sm:$0xff] }
 0x4e7   :  { %1372 = vmatprep.subr.mxu0 %v2581_v56  ;;  %1443 = vmatprep.subr.mxu1 %v2583_v57  ;;  %v3677_v56 = vld [vmem:[#allocation19_spill] sm:$0xff]  ;;  %v3678_v57 = vld [vmem:[#allocation20_spill] sm:$0xff] }
 0x4e8   :  { %1373 = vmatpush1.msra.mxu0 %v2589_v59  ;;  %1444 = vmatpush1.msra.mxu1 %v2591_v60  ;;  %v3679_v59 = vld [vmem:[#allocation21_spill] sm:$0xff]  ;;  %v3680_v60 = vld [vmem:[#allocation22_spill] sm:$0xff] }
 0x4e9   :  { %1374 = vmatprep.subr.mxu0 %v2595_v61  ;;  %1445 = vmatprep.subr.mxu1 %v2597_v62  ;;  %v3681_v61 = vld [vmem:[#allocation23_spill] sm:$0xff]  ;;  %v3682_v62 = vld [vmem:[#allocation24_spill] sm:$0xff] }
 0x4ea   :  { %1375 = vmatpush1.msra.mxu0 %v2599_v63  ;;  %1446 = vmatpush1.msra.mxu1 %v2601_v0  ;;  %v3683_v63 = vld [vmem:[#allocation25_spill] sm:$0xff]  ;;  %v3684_v0 = vld [vmem:[#allocation26_spill] sm:$0xff] }
 0x4eb   :  { %1376 = vmatprep.subr.mxu0 %v2605_v1  ;;  %1447 = vmatprep.subr.mxu1 %v2607_v2  ;;  %v3685_v1 = vld [vmem:[#allocation27_spill] sm:$0xff]  ;;  %v3686_v2 = vld [vmem:[#allocation28_spill] sm:$0xff] }
 0x4ec   :  { %1377 = vmatpush1.msra.mxu0 %v2611_v3  ;;  %1448 = vmatpush1.msra.mxu1 %v2613_v4  ;;  %v3687_v3 = vld [vmem:[#allocation29_spill] sm:$0xff]  ;;  %v3688_v4 = vld [vmem:[#allocation30_spill] sm:$0xff] }
 0x4ed   :  { %1378 = vmatprep.subr.mxu0 %v2617_v5  ;;  %1449 = vmatprep.subr.mxu1 %v2619_v6  ;;  %v3689_v5 = vmov 0.0   ;;  %v3690_v6 = vld [vmem:[#allocation31_spill] sm:$0xff] }
 0x4ee   :  { %1379 = vmatpush1.msra.mxu0 %v2623_v7  ;;  %1450 = vmatpush1.msra.mxu1 %v2625_v8  ;;  %v3086_v7 = vld [vmem:[#allocation3 + $0x7e8] sm:$0xff]  ;;  %v3089_v8 = vld [vmem:[#allocation3 + $0x7f8] sm:$0xff] }
 0x4ef   :  { %1380 = vmatprep.subr.mxu0 %v2629_v9  ;;  %1451 = vmatprep.subr.mxu1 %v2631_v10  ;;  %3691 = vst [vmem:[#allocation8_spill] sm:$0xff] %v3086_v7  ;;  %3692 = vst [vmem:[#allocation9_spill] sm:$0xff] %v3089_v8 }
 0x4f0   :  { %1381 = vmatpush1.msra.mxu0 %v2635_v11  ;;  %1452 = vmatpush1.msra.mxu1 %v2637_v12 }
 0x4f1   :  { %1382 = vmatprep.subr.mxu0 %v2641_v13  ;;  %1453 = vmatprep.subr.mxu1 %v2643_v14 }
 0x4f2   :  { %1383 = vmatpush1.msra.mxu0 %v2647_v15  ;;  %1454 = vmatpush1.msra.mxu1 %v2649_v16 }
 0x4f3   :  { %1384 = vmatprep.subr.mxu0 %v2653_v17  ;;  %1455 = vmatprep.subr.mxu1 %v2655_v18  ;;  %v3693_v18 = vcombine.high %v3668_v53, %v3669_v47  ;;  %v3107_v47 = vld [vmem:[#allocation3 + $0x7c8] sm:$0xff]  ;;  %v3110_v53 = vld [vmem:[#allocation3 + $0x7d8] sm:$0xff] }
 0x4f4   :  { %1385 = vmatpush1.msra.mxu0 %v2659_v19  ;;  %1456 = vmatpush1.msra.mxu1 %v2661_v20 }
 0x4f5   :  { %1386 = vmatprep.subr.mxu0 %v2665_v21  ;;  %1457 = vmatprep.subr.mxu1 %v2667_v22 }
 0x4f6   :  { %1387 = vmatpush1.msra.mxu0 %v2671_v23  ;;  %1458 = vmatpush1.msra.mxu1 %v2673_v24 }
 0x4f7   :  { %1388 = vmatprep.subr.mxu0 %v3618_v32  ;;  %1459 = vmatprep.subr.mxu1 %v3619_v30 }
 0x4f8   :  { %1389 = vmatpush1.msra.mxu0 %v3620_v28  ;;  %1460 = vmatpush1.msra.mxu1 %v3621_v35 }
 0x4f9   :  { %1390 = vmatprep.subr.mxu0 %v3622_v43  ;;  %1461 = vmatprep.subr.mxu1 %v3671_v49  ;;  %v3152_v49 = vld [vmem:[#allocation3 + $0x770] sm:$0xff] }
 0x4fa   :  { %1391 = vmatpush1.msra.mxu0 %v3672_v50  ;;  %1462 = vmatpush1.msra.mxu1 %v3673_v51  ;;  %v3155_v50 = vld [vmem:[#allocation3 + $0x748] sm:$0xff]  ;;  %v3158_v51 = vld [vmem:[#allocation3 + $0x758] sm:$0xff] }
 0x4fb   :  { %1392 = vmatprep.subr.mxu0 %v3674_v52  ;;  %1463 = vmatprep.subr.mxu1 %v3675_v54  ;;  %v3161_v52 = vld [vmem:[#allocation3 + $0x740] sm:$0xff]  ;;  %v3164_v54 = vld [vmem:[#allocation3 + $0x750] sm:$0xff] }
 0x4fc   :  { %1393 = vmatpush1.msra.mxu0 %v3676_v55  ;;  %1464 = vmatpush1.msra.mxu1 %v3677_v56  ;;  %v3167_v55 = vld [vmem:[#allocation3 + $0x728] sm:$0xff]  ;;  %v3170_v56 = vld [vmem:[#allocation3 + $0x738] sm:$0xff] }
 0x4fd   :  { %1394 = vmatprep.subr.mxu0 %v3678_v57  ;;  %1465 = vmatprep.subr.mxu1 %v3679_v59  ;;  %v3173_v57 = vld [vmem:[#allocation3 + $0x720] sm:$0xff]  ;;  %v3176_v59 = vld [vmem:[#allocation3 + $0x730] sm:$0xff] }
 0x4fe   :  { %1395 = vmatpush1.msra.mxu0 %v3680_v60  ;;  %1466 = vmatpush1.msra.mxu1 %v3681_v61  ;;  %v3179_v60 = vld [vmem:[#allocation3 + $0x708] sm:$0xff]  ;;  %v3182_v61 = vld [vmem:[#allocation3 + $0x718] sm:$0xff] }
 0x4ff   :  { %1396 = vmatprep.subr.mxu0 %v3682_v62  ;;  %1467 = vmatprep.subr.mxu1 %v3683_v63  ;;  %v3185_v62 = vld [vmem:[#allocation3 + $0x700] sm:$0xff]  ;;  %v3188_v63 = vld [vmem:[#allocation3 + $0x710] sm:$0xff] }
 0x500   :  { %1397 = vmatpush1.msra.mxu0 %v3684_v0  ;;  %1468 = vmatpush1.msra.mxu1 %v3685_v1  ;;  %v3191_v0 = vld [vmem:[#allocation3 + $0x6e8] sm:$0xff]  ;;  %v3194_v1 = vld [vmem:[#allocation3 + $0x6f8] sm:$0xff] }
 0x501   :  { %1398 = vmatprep.subr.mxu0 %v3686_v2  ;;  %1469 = vmatprep.subr.mxu1 %v3687_v3 }
 0x502   :  { %1399 = vmatpush1.msra.mxu0 %v3688_v4  ;;  %1432 = vmatprep.mubr.f32.mxu0 %v3689_v5 }
 0x503   :  { %1470 = vmatpush1.msra.mxu1 %v3690_v6  ;;  %1503 = vmatprep.mubr.f32.mxu1 %v3689_v5 }
 0x504   :  { %1554 = vmatprep.subr.mxu0 %v3086_v7  ;;  %1625 = vmatprep.subr.mxu1 %v3089_v8 }
 0x5a3   :  { %v1248_v9 = vpop.f32.mrf.mxu0  ;;  %v1319_v10 = vpop.f32.mrf.mxu1 }
 0x5a5   :  { %v1250_v11 = vpop.f32.mrf.mxu0  ;;  %v1321_v12 = vpop.f32.mrf.mxu1 }
 0x5a6   :  { %v1328_v13 = vcombine.low %v1248_v9, %v1250_v11  ;;  %v1329_v14 = vcombine.low %v1319_v10, %v1321_v12  ;;  %v3197_v9 = vld [vmem:[#allocation3 + $0x6e0] sm:$0xff]  ;;  %v3200_v10 = vld [vmem:[#allocation3 + $0x6f0] sm:$0xff]  ;;  %v3203_v11 = vld [vmem:[#allocation3 + $0x6c8] sm:$0xff] }
 0x5a7   :  { %v3206_v12 = vld [vmem:[#allocation3 + $0x6d8] sm:$0xff] }
 0x5a8   :  { %v1336_v15 = vrot.slane %v1328_v13, %v2825_v33  ;;  %v1343_v16 = vrot.slane %v1329_v14, %v2825_v33  ;;  %v3209_v13 = vld [vmem:[#allocation3 + $0x6c0] sm:$0xff]  ;;  %v3212_v14 = vld [vmem:[#allocation3 + $0x6d0] sm:$0xff] }
 0x5aa   :  { %v1344_v17 = vcombine.low %v1336_v15, %v1343_v16  ;;  %v3215_v15 = vld [vmem:[#allocation3 + $0x6a8] sm:$0xff]  ;;  %v3218_v16 = vld [vmem:[#allocation3 + $0x6b8] sm:$0xff] }
 0x5ac   :  { %v1346_v19 = vadd.f32 %v1344_v17, %v3693_v18  ;;  %v3221_v17 = vld [vmem:[#allocation3 + $0x6a0] sm:$0xff]  ;;  %v3224_v18 = vld [vmem:[#allocation3 + $0x6b0] sm:$0xff] }
 0x5ae   :  { %v2208_v20 = vmul.f32 -1.442695, %v1346_v19  ;;  %v1354_v23 = vrot.slane %v1346_v19, 6  ;;  %v3227_v19 = vld [vmem:[#allocation3 + $0x688] sm:$0xff] }
 0x5b0   :  { %2401 = vpow2.f32 %v2208_v20  ;;  %v3230_v20 = vld [vmem:[#allocation3 + $0x698] sm:$0xff] }
 0x5b1   :  { %3694 = vst [vmem:[#allocation10_spill] sm:$0xff] %v3230_v20 }
 0x5bd   :  { %v2402_v21 = vpop.eup %2401 }
 0x5be   :  { %v1350_v22 = vadd.f32 1.0, %v2402_v21  ;;  %v3233_v21 = vld [vmem:[#allocation3 + $0x680] sm:$0xff] }
 0x5bf   :  { %3695 = vst [vmem:[#allocation11_spill] sm:$0xff] %v3233_v21 }
 0x5c0   :  { %2403 = vrcp.f32 %v1350_v22  ;;  %v3236_v22 = vld [vmem:[#allocation3 + $0x690] sm:$0xff] }
 0x5c1   :  { %2405 = vtanh.f32 %v1354_v23  ;;  %3696 = vst [vmem:[#allocation12_spill] sm:$0xff] %v3236_v22  ;;  %v3239_v23 = vld [vmem:[#allocation3 + $0x668] sm:$0xff] }
 0x5c2   :  { %3697 = vst [vmem:[#allocation6_spill] sm:$0xff] %v3239_v23 }
 0x5cd   :  { %v2404_v24 = vpop.eup %2403 }
 0x5ce   :  { %v1359_v32 = vrot.slane %v2404_v24, 2  ;;  %v2406_v30 = vpop.eup %2405  ;;  %v1357_v35 = vmul.f32 %v2404_v24, %v3019_v36  ;;  %v1364_v41 = vrot.slane %v2404_v24, 4  ;;  %v3140_v36 = vld [vmem:[#allocation3 + $0x790] sm:$0xff]  ;;  %v3242_v24 = vld [vmem:[#allocation3 + $0x678] sm:$0xff] }
 0x5cf   :  { %3698 = vst [vmem:[#allocation7_spill] sm:$0xff] %v3242_v24 }
 0x5d0   :  { %v1361_v28 = vmul.f32 %v2406_v30, %v1359_v32  ;;  %v3245_v32 = vld [vmem:[#allocation3 + $0x660] sm:$0xff]  ;;  %v3248_v30 = vld [vmem:[#allocation3 + $0x670] sm:$0xff] }
 0x5d1   :  { %3699 = vst [vmem:[#allocation32_spill] sm:$0xff] %v3245_v32  ;;  %3700 = vst [vmem:[#allocation33_spill] sm:$0xff] %v3248_v30 }
 0x5d2   :  { %v3098_v43 = vadd.f32 %v1361_v28, %v1357_v35  ;;  %v3251_v28 = vld [vmem:[#allocation3 + $0x648] sm:$0xff]  ;;  %v3254_v35 = vld [vmem:[#allocation3 + $0x658] sm:$0xff] }
 0x5d3   :  { %3701 = vst [vmem:[#allocation13_spill] sm:$0xff] %v3251_v28  ;;  %3702 = vst [vmem:[#allocation14_spill] sm:$0xff] %v3254_v35 }
 0x5d4   :  { %2407 = vtanh.f32 %v3098_v43 }
 0x5e1   :  { %v2408_v34 = vpop.eup %2407 }
 0x5e2   :  { %v1366_v45 = vmul.f32 %v2408_v34, %v1364_v41  ;;  %v3257_v41 = vld [vmem:[#allocation3 + $0x640] sm:$0xff]  ;;  %v3260_v34 = vld [vmem:[#allocation3 + $0x650] sm:$0xff] }
 0x5e3   :  { %3703 = vst [vmem:[#allocation15_spill] sm:$0xff] %v3257_v41  ;;  %3704 = vst [vmem:[#allocation16_spill] sm:$0xff] %v3260_v34 }
 0x5e4   :  { %1433 = vmatmul.mubr.f32.vlgmr.msra.gmra.mxu0 %v1366_v45  ;;  %1504 = vmatmul.mubr.f32.vlgmr.msra.gmra.mxu1 %v1366_v45  ;;  %v3263_v45 = vld [vmem:[#allocation3 + $0x628] sm:$0xff] }
 0x5e5   :  { %1555 = vmatpush1.msra.mxu0 %v3101_v31  ;;  %1626 = vmatpush1.msra.mxu1 %v3104_v44  ;;  %3705 = vst [vmem:[#allocation17_spill] sm:$0xff] %v3263_v45 }
 0x5e6   :  { %1556 = vmatprep.subr.mxu0 %v3107_v47  ;;  %1627 = vmatprep.subr.mxu1 %v3110_v53 }
 0x5e7   :  { %1557 = vmatpush1.msra.mxu0 %v3113_v42  ;;  %1628 = vmatpush1.msra.mxu1 %v3116_v38 }
 0x5e8   :  { %1558 = vmatprep.subr.mxu0 %v3119_v29  ;;  %1629 = vmatprep.subr.mxu1 %v3122_v39 }
 0x5e9   :  { %1559 = vmatpush1.msra.mxu0 %v3125_v46  ;;  %1630 = vmatpush1.msra.mxu1 %v3128_v48 }
 0x5ea   :  { %1560 = vmatprep.subr.mxu0 %v3131_v40  ;;  %1631 = vmatprep.subr.mxu1 %v3134_v27 }
 0x5eb   :  { %1561 = vmatpush1.msra.mxu0 %v3137_v26  ;;  %1632 = vmatpush1.msra.mxu1 %v3140_v36 }
 0x5ec   :  { %1562 = vmatprep.subr.mxu0 %v3143_v25  ;;  %1633 = vmatprep.subr.mxu1 %v3146_v37 }
 0x5ed   :  { %1563 = vmatpush1.msra.mxu0 %v3149_v58  ;;  %1634 = vmatpush1.msra.mxu1 %v3152_v49 }
 0x5ee   :  { %1564 = vmatprep.subr.mxu0 %v3155_v50  ;;  %1635 = vmatprep.subr.mxu1 %v3158_v51 }
 0x5ef   :  { %1565 = vmatpush1.msra.mxu0 %v3161_v52  ;;  %1636 = vmatpush1.msra.mxu1 %v3164_v54 }
 0x5f0   :  { %1566 = vmatprep.subr.mxu0 %v3167_v55  ;;  %1637 = vmatprep.subr.mxu1 %v3170_v56 }
 0x5f1   :  { %1567 = vmatpush1.msra.mxu0 %v3173_v57  ;;  %1638 = vmatpush1.msra.mxu1 %v3176_v59 }
 0x5f2   :  { %1568 = vmatprep.subr.mxu0 %v3179_v60  ;;  %1639 = vmatprep.subr.mxu1 %v3182_v61 }
 0x5f3   :  { %1569 = vmatpush1.msra.mxu0 %v3185_v62  ;;  %1640 = vmatpush1.msra.mxu1 %v3188_v63 }
 0x5f4   :  { %1570 = vmatprep.subr.mxu0 %v3191_v0  ;;  %1641 = vmatprep.subr.mxu1 %v3194_v1 }
 0x5f5   :  { %1571 = vmatpush1.msra.mxu0 %v3197_v9  ;;  %1642 = vmatpush1.msra.mxu1 %v3200_v10 }
 0x5f6   :  { %1572 = vmatprep.subr.mxu0 %v3203_v11  ;;  %1643 = vmatprep.subr.mxu1 %v3206_v12 }
 0x5f7   :  { %1573 = vmatpush1.msra.mxu0 %v3209_v13  ;;  %1644 = vmatpush1.msra.mxu1 %v3212_v14 }
 0x5f8   :  { %1574 = vmatprep.subr.mxu0 %v3215_v15  ;;  %1645 = vmatprep.subr.mxu1 %v3218_v16 }
 0x5f9   :  { %1575 = vmatpush1.msra.mxu0 %v3221_v17  ;;  %1646 = vmatpush1.msra.mxu1 %v3224_v18 }
 0x5fa   :  { %1576 = vmatprep.subr.mxu0 %v3227_v19  ;;  %1647 = vmatprep.subr.mxu1 %v3230_v20 }
 0x5fb   :  { %1577 = vmatpush1.msra.mxu0 %v3233_v21  ;;  %1648 = vmatpush1.msra.mxu1 %v3236_v22 }
 0x5fc   :  { %1578 = vmatprep.subr.mxu0 %v3239_v23  ;;  %1649 = vmatprep.subr.mxu1 %v3242_v24  ;;  %v3710_v24 = vld [vmem:[#allocation36_spill] sm:$0xff] }
 0x5fd   :  { %1579 = vmatpush1.msra.mxu0 %v3245_v32  ;;  %1650 = vmatpush1.msra.mxu1 %v3248_v30  ;;  %v3266_v30 = vld [vmem:[#allocation3 + $0x638] sm:$0xff]  ;;  %v3709_v32 = vld [vmem:[#allocation34_spill] sm:$0xff] }
 0x5fe   :  { %1580 = vmatprep.subr.mxu0 %v3251_v28  ;;  %1651 = vmatprep.subr.mxu1 %v3254_v35  ;;  %3706 = vst [vmem:[#allocation18_spill] sm:$0xff] %v3266_v30  ;;  %v3269_v28 = vld [vmem:[#allocation3 + $0x620] sm:$0xff]  ;;  %v3272_v35 = vld [vmem:[#allocation3 + $0x630] sm:$0xff] }
 0x5ff   :  { %1581 = vmatpush1.msra.mxu0 %v3257_v41  ;;  %1652 = vmatpush1.msra.mxu1 %v3260_v34  ;;  %3707 = vst [vmem:[#allocation19_spill] sm:$0xff] %v3269_v28  ;;  %3708 = vst [vmem:[#allocation20_spill] sm:$0xff] %v3272_v35 }
 0x600   :  { %1582 = vmatprep.subr.mxu0 %v3263_v45  ;;  %1653 = vmatprep.subr.mxu1 %v3266_v30 }
 0x601   :  { %1583 = vmatpush1.msra.mxu0 %v3269_v28  ;;  %1654 = vmatpush1.msra.mxu1 %v3272_v35 }
 0x602   :  { %1584 = vmatprep.subr.mxu0 %v3686_v2  ;;  %1655 = vmatprep.subr.mxu1 %v3687_v3 }
 0x603   :  { %1585 = vmatpush1.msra.mxu0 %v3688_v4  ;;  %1618 = vmatprep.mubr.f32.mxu0 %v3689_v5 }
 0x604   :  { %1656 = vmatpush1.msra.mxu1 %v3690_v6  ;;  %1689 = vmatprep.mubr.f32.mxu1 %v3689_v5  ;;  %v3711_v6 = vcombine.low %v3709_v32, %v3710_v24 }
 0x605   :  { %1740 = vmatprep.subr.mxu0 %v3086_v7  ;;  %1811 = vmatprep.subr.mxu1 %v3089_v8 }
 0x6a4   :  { %v1434_v28 = vpop.f32.mrf.mxu0  ;;  %v1505_v30 = vpop.f32.mrf.mxu1 }
 0x6a6   :  { %v1436_v45 = vpop.f32.mrf.mxu0  ;;  %v1507_v35 = vpop.f32.mrf.mxu1 }
 0x6a7   :  { %v1514_v34 = vcombine.low %v1434_v28, %v1436_v45  ;;  %v1515_v2 = vcombine.low %v1505_v30, %v1507_v35 }
 0x6a9   :  { %v1522_v3 = vrot.slane %v1514_v34, %v2825_v33  ;;  %v1529_v4 = vrot.slane %v1515_v2, %v2825_v33 }
 0x6ab   :  { %v1530_v41 = vcombine.low %v1522_v3, %v1529_v4  ;;  %v3720_v3 = vld [vmem:[#allocation14_spill] sm:$0xff]  ;;  %v3721_v4 = vld [vmem:[#allocation15_spill] sm:$0xff] }
 0x6ad   :  { %v1532_v23 = vadd.f32 %v1530_v41, %v3711_v6  ;;  %v3722_v6 = vld [vmem:[#allocation16_spill] sm:$0xff] }
 0x6af   :  { %v2209_v5 = vmul.f32 -1.442695, %v1532_v23  ;;  %v1540_v8 = vrot.slane %v1532_v23, 6  ;;  %v3719_v23 = vld [vmem:[#allocation13_spill] sm:$0xff] }
 0x6b1   :  { %2409 = vpow2.f32 %v2209_v5  ;;  %v3712_v5 = vld [vmem:[#allocation10_spill] sm:$0xff] }
 0x6be   :  { %v2410_v7 = vpop.eup %2409 }
 0x6bf   :  { %v1536_v22 = vadd.f32 1.0, %v2410_v7  ;;  %v3713_v7 = vld [vmem:[#allocation11_spill] sm:$0xff] }
 0x6c1   :  { %2411 = vrcp.f32 %v1536_v22  ;;  %v3718_v22 = vld [vmem:[#allocation33_spill] sm:$0xff] }
 0x6c2   :  { %2413 = vtanh.f32 %v1540_v8  ;;  %v3714_v8 = vld [vmem:[#allocation12_spill] sm:$0xff] }
 0x6ce   :  { %v2412_v21 = vpop.eup %2411 }
 0x6cf   :  { %v1545_v20 = vrot.slane %v2412_v21, 2  ;;  %v2414_v28 = vpop.eup %2413  ;;  %v1543_v35 = vmul.f32 %v2412_v21, %v3098_v43  ;;  %v1550_v45 = vrot.slane %v2412_v21, 4  ;;  %v3715_v43 = vld [vmem:[#allocation6_spill] sm:$0xff]  ;;  %v3717_v21 = vld [vmem:[#allocation32_spill] sm:$0xff] }
 0x6d1   :  { %v1547_v30 = vmul.f32 %v2414_v28, %v1545_v20  ;;  %v3716_v20 = vld [vmem:[#allocation7_spill] sm:$0xff]  ;;  %v3723_v28 = vld [vmem:[#allocation17_spill] sm:$0xff] }
 0x6d3   :  { %v3289_v34 = vadd.f32 %v1547_v30, %v1543_v35  ;;  %v3724_v30 = vld [vmem:[#allocation18_spill] sm:$0xff]  ;;  %v3725_v35 = vld [vmem:[#allocation19_spill] sm:$0xff] }
 0x6d5   :  { %2415 = vtanh.f32 %v3289_v34 }
 0x6e2   :  { %v2416_v2 = vpop.eup %2415 }
 0x6e3   :  { %v1552_v41 = vmul.f32 %v2416_v2, %v1550_v45  ;;  %v3726_v45 = vld [vmem:[#allocation20_spill] sm:$0xff]  ;;  %v3350_v2 = vld [vmem:[#allocation3 + $0x608] sm:$0xff] }
 0x6e4   :  { %3727 = vst [vmem:[#allocation21_spill] sm:$0xff] %v3350_v2 }
 0x6e5   :  { %1619 = vmatmul.mubr.f32.vlgmr.msra.gmra.mxu0 %v1552_v41  ;;  %1690 = vmatmul.mubr.f32.vlgmr.msra.gmra.mxu1 %v1552_v41  ;;  %v3353_v41 = vld [vmem:[#allocation3 + $0x618] sm:$0xff] }
 0x6e6   :  { %1741 = vmatpush1.msra.mxu0 %v3101_v31  ;;  %1812 = vmatpush1.msra.mxu1 %v3104_v44  ;;  %3728 = vst [vmem:[#allocation22_spill] sm:$0xff] %v3353_v41 }
 0x6e7   :  { %1742 = vmatprep.subr.mxu0 %v3107_v47  ;;  %1813 = vmatprep.subr.mxu1 %v3110_v53 }
 0x6e8   :  { %1743 = vmatpush1.msra.mxu0 %v3113_v42  ;;  %1814 = vmatpush1.msra.mxu1 %v3116_v38 }
 0x6e9   :  { %1744 = vmatprep.subr.mxu0 %v3119_v29  ;;  %1815 = vmatprep.subr.mxu1 %v3122_v39 }
 0x6ea   :  { %1745 = vmatpush1.msra.mxu0 %v3125_v46  ;;  %1816 = vmatpush1.msra.mxu1 %v3128_v48 }
 0x6eb   :  { %1746 = vmatprep.subr.mxu0 %v3131_v40  ;;  %1817 = vmatprep.subr.mxu1 %v3134_v27 }
 0x6ec   :  { %1747 = vmatpush1.msra.mxu0 %v3137_v26  ;;  %1818 = vmatpush1.msra.mxu1 %v3140_v36 }
 0x6ed   :  { %1748 = vmatprep.subr.mxu0 %v3143_v25  ;;  %1819 = vmatprep.subr.mxu1 %v3146_v37 }
 0x6ee   :  { %1749 = vmatpush1.msra.mxu0 %v3149_v58  ;;  %1820 = vmatpush1.msra.mxu1 %v3152_v49 }
 0x6ef   :  { %1750 = vmatprep.subr.mxu0 %v3155_v50  ;;  %1821 = vmatprep.subr.mxu1 %v3158_v51 }
 0x6f0   :  { %1751 = vmatpush1.msra.mxu0 %v3161_v52  ;;  %1822 = vmatpush1.msra.mxu1 %v3164_v54 }
 0x6f1   :  { %1752 = vmatprep.subr.mxu0 %v3167_v55  ;;  %1823 = vmatprep.subr.mxu1 %v3170_v56 }
 0x6f2   :  { %1753 = vmatpush1.msra.mxu0 %v3173_v57  ;;  %1824 = vmatpush1.msra.mxu1 %v3176_v59 }
 0x6f3   :  { %1754 = vmatprep.subr.mxu0 %v3179_v60  ;;  %1825 = vmatprep.subr.mxu1 %v3182_v61 }
 0x6f4   :  { %1755 = vmatpush1.msra.mxu0 %v3185_v62  ;;  %1826 = vmatpush1.msra.mxu1 %v3188_v63 }
 0x6f5   :  { %1756 = vmatprep.subr.mxu0 %v3191_v0  ;;  %1827 = vmatprep.subr.mxu1 %v3194_v1 }
 0x6f6   :  { %1757 = vmatpush1.msra.mxu0 %v3197_v9  ;;  %1828 = vmatpush1.msra.mxu1 %v3200_v10 }
 0x6f7   :  { %1758 = vmatprep.subr.mxu0 %v3203_v11  ;;  %1829 = vmatprep.subr.mxu1 %v3206_v12 }
 0x6f8   :  { %1759 = vmatpush1.msra.mxu0 %v3209_v13  ;;  %1830 = vmatpush1.msra.mxu1 %v3212_v14 }
 0x6f9   :  { %1760 = vmatprep.subr.mxu0 %v3215_v15  ;;  %1831 = vmatprep.subr.mxu1 %v3218_v16 }
 0x6fa   :  { %1761 = vmatpush1.msra.mxu0 %v3221_v17  ;;  %1832 = vmatpush1.msra.mxu1 %v3224_v18 }
 0x6fb   :  { %1762 = vmatprep.subr.mxu0 %v3227_v19  ;;  %1833 = vmatprep.subr.mxu1 %v3712_v5 }
 0x6fc   :  { %1763 = vmatpush1.msra.mxu0 %v3713_v7  ;;  %1834 = vmatpush1.msra.mxu1 %v3714_v8 }
 0x6fd   :  { %1764 = vmatprep.subr.mxu0 %v3715_v43  ;;  %1835 = vmatprep.subr.mxu1 %v3716_v20 }
 0x6fe   :  { %1765 = vmatpush1.msra.mxu0 %v3717_v21  ;;  %1836 = vmatpush1.msra.mxu1 %v3718_v22 }
 0x6ff   :  { %1766 = vmatprep.subr.mxu0 %v3719_v23  ;;  %1837 = vmatprep.subr.mxu1 %v3720_v3  ;;  %v3356_v3 = vld [vmem:[#allocation3 + $0x600] sm:$0xff] }
 0x700   :  { %1767 = vmatpush1.msra.mxu0 %v3721_v4  ;;  %1838 = vmatpush1.msra.mxu1 %v3722_v6  ;;  %3729 = vst [vmem:[#allocation23_spill] sm:$0xff] %v3356_v3  ;;  %v3730_v6 = vmov 0.0  }
 0x701   :  { %1768 = vmatprep.subr.mxu0 %v3723_v28  ;;  %1839 = vmatprep.subr.mxu1 %v3724_v30  ;;  %v3360_v28 = vld [vmem:[#allocation3 + $0x610] sm:$0xff] }
 0x702   :  { %1769 = vmatpush1.msra.mxu0 %v3725_v35  ;;  %1840 = vmatpush1.msra.mxu1 %v3726_v45  ;;  %3731 = vst [vmem:[#allocation24_spill] sm:$0xff] %v3360_v28  ;;  %v3732_v45 = vld [vmem:[#allocation8_spill] sm:$0xff]  ;;  %v3733_v35 = vld [vmem:[#allocation9_spill] sm:$0xff] }
 0x703   :  { %1770 = vmatprep.subr.mxu0 %v3350_v2  ;;  %1841 = vmatprep.subr.mxu1 %v3353_v41 }
 0x704   :  { %1771 = vmatpush1.msra.mxu0 %v3356_v3  ;;  %1804 = vmatprep.mubr.f32.mxu0 %v3730_v6 }
 0x705   :  { %1842 = vmatpush1.msra.mxu1 %v3360_v28  ;;  %1875 = vmatprep.mubr.f32.mxu1 %v3730_v6  ;;  %v3734_v28 = vcombine.high %v3709_v32, %v3710_v24 }
 0x706   :  { %1926 = vmatprep.subr.mxu0 %v3732_v45  ;;  %1997 = vmatprep.subr.mxu1 %v3733_v35 }
 0x7a5   :  { %v1620_v2 = vpop.f32.mrf.mxu0  ;;  %v1691_v30 = vpop.f32.mrf.mxu1 }
 0x7a7   :  { %v1622_v4 = vpop.f32.mrf.mxu0  ;;  %v1693_v41 = vpop.f32.mrf.mxu1 }
 0x7a8   :  { %v1700_v23 = vcombine.low %v1620_v2, %v1622_v4  ;;  %v1701_v22 = vcombine.low %v1691_v30, %v1693_v41  ;;  %v2120_v41 = vld [vmem:[#allocation3 + $0x900] sm:$0xff] }
 0x7aa   :  { %v1708_v3 = vrot.slane %v1700_v23, %v2825_v33  ;;  %v1715_v21 = vrot.slane %v1701_v22, %v2825_v33  ;;  %v2124_v22 = vld [vmem:[#allocation3 + $0x980] sm:$0xff] }
 0x7ac   :  { %v1716_v20 = vcombine.low %v1708_v3, %v1715_v21  ;;  %v2123_v3 = vld [vmem:[#allocation3 + $0x960] sm:$0xff] }
 0x7ae   :  { %v1718_v43 = vadd.f32 %v1716_v20, %v3734_v28  ;;  %v2125_v20 = vld [vmem:[#allocation3 + $0x9a0] sm:$0xff] }
 0x7af   :  { %v2121_v28 = vld [vmem:[#allocation3 + $0x920] sm:$0xff] }
 0x7b0   :  { %v2210_v6 = vmul.f32 -1.442695, %v1718_v43  ;;  %v1726_v35 = vrot.slane %v1718_v43, 6  ;;  %v2126_v43 = vld [vmem:[#allocation3 + $0x9c0] sm:$0xff] }
 0x7b2   :  { %2417 = vpow2.f32 %v2210_v6  ;;  %v2122_v6 = vld [vmem:[#allocation3 + $0x940] sm:$0xff] }
 0x7bf   :  { %v2418_v45 = vpop.eup %2417 }
 0x7c0   :  { %v1722_v8 = vadd.f32 1.0, %v2418_v45  ;;  %v2119_v45 = vld [vmem:[#allocation3 + $0x8e0] sm:$0xff] }
 0x7c2   :  { %2419 = vrcp.f32 %v1722_v8  ;;  %v2127_v8 = vld [vmem:[#allocation3 + $0x9e0] sm:$0xff] }
 0x7c3   :  { %2421 = vtanh.f32 %v1726_v35  ;;  %v2118_v35 = vld [vmem:[#allocation3 + $0x8c0] sm:$0xff] }
 0x7cf   :  { %v2420_v7 = vpop.eup %2419 }
 0x7d0   :  { %v1731_v5 = vrot.slane %v2420_v7, 2  ;;  %v2422_v4 = vpop.eup %2421  ;;  %v1729_v23 = vmul.f32 %v2420_v7, %v3289_v34  ;;  %v1736_v21 = vrot.slane %v2420_v7, 4 }
 0x7d2   :  { %v1733_v30 = vmul.f32 %v2422_v4, %v1731_v5  ;;  %v2117_v4 = vld [vmem:[#allocation3 + $0x8a0] sm:$0xff] }
 0x7d4   :  { %v3372_v2 = vadd.f32 %v1733_v30, %v1729_v23  ;;  %v2116_v30 = vld [vmem:[#allocation3 + $0x880] sm:$0xff] }
 0x7d5   :  { %v2115_v23 = vld [vmem:[#allocation3 + $0x860] sm:$0xff] }
 0x7d6   :  { %2423 = vtanh.f32 %v3372_v2 }
 0x7e3   :  { %v2424_v24 = vpop.eup %2423 }
 0x7e4   :  { %v1738_v32 = vmul.f32 %v2424_v24, %v1736_v21  ;;  %v2113_v21 = vld [vmem:[#allocation3 + $0x820] sm:$0xff] }
 0x7e5   :  { %v2112_v24 = vld [vmem:[#allocation3 + $0x800] sm:$0xff] }
 0x7e6   :  { %1805 = vmatmul.mubr.f32.vlgmr.msra.gmra.mxu0 %v1738_v32  ;;  %1876 = vmatmul.mubr.f32.vlgmr.msra.gmra.mxu1 %v1738_v32 }
 0x7e7   :  { %1927 = vmatpush1.msra.mxu0 %v3101_v31  ;;  %1998 = vmatpush1.msra.mxu1 %v3104_v44  ;;  %v3735_v31 = vld [vmem:[#allocation10_spill] sm:$0xff]  ;;  %v3736_v44 = vld [vmem:[#allocation11_spill] sm:$0xff] }
 0x7e8   :  { %1928 = vmatprep.subr.mxu0 %v3107_v47  ;;  %1999 = vmatprep.subr.mxu1 %v3110_v53  ;;  %v3737_v47 = vld [vmem:[#allocation12_spill] sm:$0xff]  ;;  %v3738_v53 = vld [vmem:[#allocation6_spill] sm:$0xff] }
 0x7e9   :  { %1929 = vmatpush1.msra.mxu0 %v3113_v42  ;;  %2000 = vmatpush1.msra.mxu1 %v3116_v38  ;;  %v3739_v42 = vld [vmem:[#allocation7_spill] sm:$0xff]  ;;  %v3740_v38 = vld [vmem:[#allocation32_spill] sm:$0xff] }
 0x7ea   :  { %1930 = vmatprep.subr.mxu0 %v3119_v29  ;;  %2001 = vmatprep.subr.mxu1 %v3122_v39  ;;  %v3741_v29 = vld [vmem:[#allocation33_spill] sm:$0xff] }
 0x7eb   :  { %1931 = vmatpush1.msra.mxu0 %v3125_v46  ;;  %2002 = vmatpush1.msra.mxu1 %v3128_v48  ;;  %v3742_v39 = vld [vmem:[#allocation13_spill] sm:$0xff]  ;;  %v3743_v46 = vld [vmem:[#allocation14_spill] sm:$0xff]  ;;  %v3744_v48 = vld [vmem:[#allocation15_spill] sm:$0xff] }
 0x7ec   :  { %1932 = vmatprep.subr.mxu0 %v3131_v40  ;;  %2003 = vmatprep.subr.mxu1 %v3134_v27  ;;  %v3745_v40 = vld [vmem:[#allocation16_spill] sm:$0xff]  ;;  %v3746_v27 = vld [vmem:[#allocation17_spill] sm:$0xff] }
 0x7ed   :  { %1933 = vmatpush1.msra.mxu0 %v3137_v26  ;;  %2004 = vmatpush1.msra.mxu1 %v3140_v36  ;;  %v3747_v26 = vld [vmem:[#allocation18_spill] sm:$0xff]  ;;  %v3748_v36 = vld [vmem:[#allocation19_spill] sm:$0xff] }
 0x7ee   :  { %1934 = vmatprep.subr.mxu0 %v3143_v25  ;;  %2005 = vmatprep.subr.mxu1 %v3146_v37  ;;  %v3749_v25 = vld [vmem:[#allocation20_spill] sm:$0xff]  ;;  %v3750_v37 = vld [vmem:[#allocation21_spill] sm:$0xff] }
 0x7ef   :  { %1935 = vmatpush1.msra.mxu0 %v3149_v58  ;;  %2006 = vmatpush1.msra.mxu1 %v3152_v49  ;;  %v3751_v58 = vld [vmem:[#allocation22_spill] sm:$0xff]  ;;  %v3752_v49 = vld [vmem:[#allocation23_spill] sm:$0xff] }
 0x7f0   :  { %1936 = vmatprep.subr.mxu0 %v3155_v50  ;;  %2007 = vmatprep.subr.mxu1 %v3158_v51  ;;  %v3753_v50 = vmov 0.0   ;;  %v3754_v51 = vld [vmem:[#allocation24_spill] sm:$0xff] }
 0x7f1   :  { %1937 = vmatpush1.msra.mxu0 %v3161_v52  ;;  %2008 = vmatpush1.msra.mxu1 %v3164_v54 }
 0x7f2   :  { %1938 = vmatprep.subr.mxu0 %v3167_v55  ;;  %2009 = vmatprep.subr.mxu1 %v3170_v56 }
 0x7f3   :  { %1939 = vmatpush1.msra.mxu0 %v3173_v57  ;;  %2010 = vmatpush1.msra.mxu1 %v3176_v59 }
 0x7f4   :  { %1940 = vmatprep.subr.mxu0 %v3179_v60  ;;  %2011 = vmatprep.subr.mxu1 %v3182_v61 }
 0x7f5   :  { %1941 = vmatpush1.msra.mxu0 %v3185_v62  ;;  %2012 = vmatpush1.msra.mxu1 %v3188_v63  ;;  %v3755_v63 = vld [vmem:[#allocation35_spill] sm:$0xff] }
 0x7f6   :  { %1942 = vmatprep.subr.mxu0 %v3191_v0  ;;  %2013 = vmatprep.subr.mxu1 %v3194_v1  ;;  %v3756_v0 = vld [vmem:[#allocation37_spill] sm:$0xff] }
 0x7f7   :  { %1943 = vmatpush1.msra.mxu0 %v3197_v9  ;;  %2014 = vmatpush1.msra.mxu1 %v3200_v10  ;;  %v3757_v1 = vcombine.low %v3755_v63, %v3756_v0 }
 0x7f8   :  { %1944 = vmatprep.subr.mxu0 %v3203_v11  ;;  %2015 = vmatprep.subr.mxu1 %v3206_v12 }
 0x7f9   :  { %1945 = vmatpush1.msra.mxu0 %v3209_v13  ;;  %2016 = vmatpush1.msra.mxu1 %v3212_v14 }
 0x7fa   :  { %1946 = vmatprep.subr.mxu0 %v3215_v15  ;;  %2017 = vmatprep.subr.mxu1 %v3218_v16 }
 0x7fb   :  { %1947 = vmatpush1.msra.mxu0 %v3221_v17  ;;  %2018 = vmatpush1.msra.mxu1 %v3224_v18 }
 0x7fc   :  { %1948 = vmatprep.subr.mxu0 %v3227_v19  ;;  %2019 = vmatprep.subr.mxu1 %v3735_v31 }
 0x7fd   :  { %1949 = vmatpush1.msra.mxu0 %v3736_v44  ;;  %2020 = vmatpush1.msra.mxu1 %v3737_v47 }
 0x7fe   :  { %1950 = vmatprep.subr.mxu0 %v3738_v53  ;;  %2021 = vmatprep.subr.mxu1 %v3739_v42 }
 0x7ff   :  { %1951 = vmatpush1.msra.mxu0 %v3740_v38  ;;  %2022 = vmatpush1.msra.mxu1 %v3741_v29 }
 0x800   :  { %1952 = vmatprep.subr.mxu0 %v3742_v39  ;;  %2023 = vmatprep.subr.mxu1 %v3743_v46  ;;  %v3758_v46 = vcombine.high %v3755_v63, %v3756_v0 }
 0x801   :  { %1953 = vmatpush1.msra.mxu0 %v3744_v48  ;;  %2024 = vmatpush1.msra.mxu1 %v3745_v40 }
 0x802   :  { %1954 = vmatprep.subr.mxu0 %v3746_v27  ;;  %2025 = vmatprep.subr.mxu1 %v3747_v26 }
 0x803   :  { %1955 = vmatpush1.msra.mxu0 %v3748_v36  ;;  %2026 = vmatpush1.msra.mxu1 %v3749_v25 }
 0x804   :  { %1956 = vmatprep.subr.mxu0 %v3750_v37  ;;  %2027 = vmatprep.subr.mxu1 %v3751_v58 }
 0x805   :  { %1957 = vmatpush1.msra.mxu0 %v3752_v49  ;;  %1990 = vmatprep.mubr.f32.mxu0 %v3753_v50 }
 0x806   :  { %2028 = vmatpush1.msra.mxu1 %v3754_v51  ;;  %2061 = vmatprep.mubr.f32.mxu1 %v3753_v50 }
 0x807   :  { %2336 = vmatprep.subr.mxu0 %v3753_v50 }
 0x8a6   :  { %v1806_v52 = vpop.f32.mrf.mxu0  ;;  %v1877_v54 = vpop.f32.mrf.mxu1 }
 0x8a8   :  { %v1808_v55 = vpop.f32.mrf.mxu0  ;;  %v1879_v56 = vpop.f32.mrf.mxu1 }
 0x8a9   :  { %v1886_v57 = vcombine.low %v1806_v52, %v1808_v55  ;;  %v1887_v59 = vcombine.low %v1877_v54, %v1879_v56  ;;  %v2128_v56 = vld [vmem:[#allocation3 + $0xa60] ss:$0 sm:$0xff] }
 0x8ab   :  { %v1894_v60 = vrot.slane %v1886_v57, %v2825_v33  ;;  %v1901_v61 = vrot.slane %v1887_v59, %v2825_v33 }
 0x8ad   :  { %v1902_v62 = vcombine.low %v1894_v60, %v1901_v61 }
 0x8af   :  { %v1904_v9 = vadd.f32 %v1902_v62, %v3757_v1 }
 0x8b1   :  { %v2211_v10 = vmul.f32 -1.442695, %v1904_v9  ;;  %v1912_v13 = vrot.slane %v1904_v9, 6 }
 0x8b3   :  { %2425 = vpow2.f32 %v2211_v10 }
 0x8c0   :  { %v2426_v11 = vpop.eup %2425 }
 0x8c1   :  { %v1908_v12 = vadd.f32 1.0, %v2426_v11 }
 0x8c3   :  { %2427 = vrcp.f32 %v1908_v12 }
 0x8c4   :  { %2429 = vtanh.f32 %v1912_v13 }
 0x8d0   :  { %v2428_v14 = vpop.eup %2427 }
 0x8d1   :  { %v1917_v15 = vrot.slane %v2428_v14, 2  ;;  %v2430_v16 = vpop.eup %2429  ;;  %v1915_v18 = vmul.f32 %v2428_v14, %v3372_v2  ;;  %v1922_v34 = vrot.slane %v2428_v14, 4  ;;  %v2114_v2 = vld [vmem:[#allocation3 + $0x840] sm:$0xff] }
 0x8d3   :  { %v1919_v17 = vmul.f32 %v2430_v16, %v1917_v15 }
 0x8d5   :  { %v3446_v19 = vadd.f32 %v1919_v17, %v1915_v18 }
 0x8d7   :  { %2431 = vtanh.f32 %v3446_v19 }
 0x8e4   :  { %v2432_v5 = vpop.eup %2431 }
 0x8e5   :  { %v1924_v7 = vmul.f32 %v2432_v5, %v1922_v34 }
 0x8e7   :  { %1991 = vmatmul.mubr.f32.vlgmr.msra.gmra.mxu0 %v1924_v7  ;;  %2062 = vmatmul.mubr.f32.vlgmr.msra.gmra.mxu1 %v1924_v7 }
 0x8e8   :  { %2337 = vmatpush3.msra.mxu0 %v2127_v8  ;;  %2368 = vmatprep.mubr.msk.f32.mxu0 %vm2532_vm0, %v3753_v50 }
 0x8e9   :  { %2338 = vmatprep.subr.mxu0 %v3753_v50 }
 0x8ea   :  { %2339 = vmatpush3.msra.mxu0 %v2126_v43 }
 0x8eb   :  { %2340 = vmatprep.subr.mxu0 %v3753_v50 }
 0x8ec   :  { %2341 = vmatpush3.msra.mxu0 %v2125_v20 }
 0x8ed   :  { %2342 = vmatprep.subr.mxu0 %v3753_v50 }
 0x8ee   :  { %2343 = vmatpush3.msra.mxu0 %v2124_v22 }
 0x8ef   :  { %2344 = vmatprep.subr.mxu0 %v3753_v50 }
 0x8f0   :  { %2345 = vmatpush3.msra.mxu0 %v2123_v3 }
 0x8f1   :  { %2346 = vmatprep.subr.mxu0 %v3753_v50 }
 0x8f2   :  { %2347 = vmatpush3.msra.mxu0 %v2122_v6 }
 0x8f3   :  { %2348 = vmatprep.subr.mxu0 %v3753_v50 }
 0x8f4   :  { %2349 = vmatpush3.msra.mxu0 %v2121_v28 }
 0x8f5   :  { %2350 = vmatprep.subr.mxu0 %v3753_v50 }
 0x8f6   :  { %2351 = vmatpush3.msra.mxu0 %v2120_v41 }
 0x8f7   :  { %2352 = vmatprep.subr.mxu0 %v3753_v50 }
 0x8f8   :  { %2353 = vmatpush3.msra.mxu0 %v2119_v45 }
 0x8f9   :  { %2354 = vmatprep.subr.mxu0 %v3753_v50 }
 0x8fa   :  { %2355 = vmatpush3.msra.mxu0 %v2118_v35 }
 0x8fb   :  { %2356 = vmatprep.subr.mxu0 %v3753_v50 }
 0x8fc   :  { %2357 = vmatpush3.msra.mxu0 %v2117_v4 }
 0x8fd   :  { %2358 = vmatprep.subr.mxu0 %v3753_v50 }
 0x8fe   :  { %2359 = vmatpush3.msra.mxu0 %v2116_v30 }
 0x8ff   :  { %2360 = vmatprep.subr.mxu0 %v3753_v50 }
 0x900   :  { %2361 = vmatpush3.msra.mxu0 %v2115_v23 }
 0x901   :  { %2362 = vmatprep.subr.mxu0 %v3753_v50 }
 0x902   :  { %2363 = vmatpush3.msra.mxu0 %v2114_v2 }
 0x903   :  { %2364 = vmatprep.subr.mxu0 %v3753_v50 }
 0x904   :  { %2365 = vmatpush3.msra.mxu0 %v2113_v21 }
 0x905   :  { %2366 = vmatprep.subr.mxu0 %v3753_v50 }
 0x906   :  { %2367 = vmatpush3.msra.mxu0 %v2112_v24 }
 0x9a7   :  { %v1992_v32 = vpop.f32.mrf.mxu0  ;;  %v2063_v31 = vpop.f32.mrf.mxu1 }
 0x9a9   :  { %v1994_v44 = vpop.f32.mrf.mxu0  ;;  %v2065_v47 = vpop.f32.mrf.mxu1 }
 0x9aa   :  { %v2072_v53 = vcombine.low %v1992_v32, %v1994_v44  ;;  %v2073_v42 = vcombine.low %v2063_v31, %v2065_v47 }
 0x9ac   :  { %v2080_v38 = vrot.slane %v2072_v53, %v2825_v33  ;;  %v2087_v29 = vrot.slane %v2073_v42, %v2825_v33 }
 0x9ae   :  { %v2088_v39 = vcombine.low %v2080_v38, %v2087_v29 }
 0x9b0   :  { %v2090_v48 = vadd.f32 %v2088_v39, %v3758_v46 }
 0x9b2   :  { %v2212_v40 = vmul.f32 -1.442695, %v2090_v48  ;;  %v2098_v36 = vrot.slane %v2090_v48, 6 }
 0x9b4   :  { %2433 = vpow2.f32 %v2212_v40 }
 0x9c1   :  { %v2434_v27 = vpop.eup %2433 }
 0x9c2   :  { %v2094_v26 = vadd.f32 1.0, %v2434_v27 }
 0x9c4   :  { %2435 = vrcp.f32 %v2094_v26 }
 0x9c5   :  { %2437 = vtanh.f32 %v2098_v36 }
 0x9d1   :  { %v2436_v25 = vpop.eup %2435 }
 0x9d2   :  { %v2103_v37 = vrot.slane %v2436_v25, 2  ;;  %v2438_v58 = vpop.eup %2437  ;;  %v2101_v50 = vmul.f32 %v2436_v25, %v3446_v19  ;;  %v2108_v33 = vrot.slane %v2436_v25, 4 }
 0x9d4   :  { %v2105_v49 = vmul.f32 %v2438_v58, %v2103_v37 }
 0x9d6   :  { %v2106_v51 = vadd.f32 %v2105_v49, %v2101_v50 }
 0x9d8   :  { %2439 = vtanh.f32 %v2106_v51 }
 0x9e5   :  { %v2440_v52 = vpop.eup %2439 }
 0x9e6   :  { %v2110_v54 = vmul.f32 %v2440_v52, %v2108_v33 }
 0x9e8   :  { %v2111_v55 = vmax.f32 %v2110_v54, 0.0 }
 0x9ea   :  { %2369 = vmatmul.mubr.f32.vlgmr.msra.gmra.mxu0 %v2111_v55 }
 0xaaa   :  { %v2195_v57 = vpop.f32.mrf.mxu0 }
 0xaab   :  { %v2196_v59 = vadd.f32 %v2195_v57, %v2128_v56 }
 0xaac   :  { %v2370_v60 = vpop.f32.mrf.mxu0 }
 0xaad   :  { %2199 = vst [vmem:[%s3476_s2] sm:$0x3] %v2196_v59 }
 0xaae   :  { %2204 = vsyncpa [#allocation4], 1 }

</bundles_post_ra>
